<compile_context>
chip_gen: v7x
topology: tpu7x:2x2x1
jax: 0.10.0
libtpu: 0.0.40
codegen_flags: <defaults>
</compile_context>

<pallas_src>
import numpy as np
import jax
import jax.numpy as jnp
from jax.experimental import pallas as pl
from jax.experimental.pallas import tpu as pltpu

# ---------------- synthetic "args" ----------------
NUM_TOKENS    = (16, 8)   # vocab sizes of the two token streams
NEMBS         = (8, 8)    # embedding dims -> sum = 16
SUM_EMB       = sum(NEMBS)
NHID          = 32
NLAYERS       = 1
DROPOUT       = 0.0
NEMB_META     = 8
META_NFC_CENT = 16
NFC_CENT      = 16
NFC_LEFT      = 32
PRED_NFC      = 32
NUM_PITCHES   = 16
NUM_DURATIONS = 8
PRED_OUT      = NUM_PITCHES * NUM_DURATIONS  # 128


def _round_up(n, m):
    return ((n + m - 1) // m) * m


# ---------------- weight-slab row layout (bf16 -> 16-row aligned segments) ----
E_PAD     = _round_up(SUM_EMB, 16)                   # 16
ROW_WI    = 0                                        # (E, 3H)
ROW_WH    = ROW_WI    + E_PAD                        # 16   (H, 3H)
ROW_RNNFC = ROW_WH    + _round_up(NHID, 16)          # 48   (3H, NFC_LEFT)
ROW_CFC   = ROW_RNNFC + _round_up(3 * NHID, 16)      # 144  (E, NFC_CENT)
ROW_MFC   = ROW_CFC   + E_PAD                        # 160  (E, META_NFC_CENT) zero-padded rows
ROW_FCL   = ROW_MFC   + E_PAD                        # 176  (NFC_LEFT, PRED_NFC)
ROW_FCC   = ROW_FCL   + _round_up(NFC_LEFT, 16)      # 208  (NFC_CENT, PRED_NFC)
ROW_FCM   = ROW_FCC   + _round_up(NFC_CENT, 16)      # 224  (META_NFC_CENT, PRED_NFC)
ROW_PRED  = ROW_FCM   + _round_up(META_NFC_CENT, 16) # 240  (PRED_NFC, PRED_OUT)
W_ROWS    = ROW_PRED  + _round_up(PRED_NFC, 16)      # 272


# ---------------- one-time parameter packing (cached, not per-call) ----------
def pack_params(params):
    """Pack all weights into one bf16 (W_ROWS,128) slab + one f32 (8,128) bias slab."""
    g = params['gru']
    H, H3 = NHID, 3 * NHID

    wi = jnp.concatenate([g['wir'], g['wiz'], g['win']], axis=1)          # (E, 3H)
    wh = jnp.concatenate([g['whr'], g['whz'], g['whn']], axis=1)          # (H, 3H)
    # Fold bh_r, bh_z into the input bias (they only ever add to gi_r/gi_z).
    bi = jnp.concatenate([g['bir'] + g['bhr'],
                          g['biz'] + g['bhz'],
                          g['bin']], axis=1)                              # (1, 3H)
    bhn = g['bhn']                                                        # (1, H)

    def put(slab, row, mat):
        r, c = mat.shape
        return slab.at[row:row + r, 0:c].set(mat)

    w = jnp.zeros((W_ROWS, 128), jnp.float32)
    w = put(w, ROW_WI,    wi)
    w = put(w, ROW_WH,    wh)
    w = put(w, ROW_RNNFC, params['w_rnnfc'])
    w = put(w, ROW_CFC,   params['w_cfc'])
    w = put(w, ROW_MFC,   params['w_mfc'])      # rows NEMB_META..E_PAD stay zero
    w = put(w, ROW_FCL,   params['w_fc_l'])
    w = put(w, ROW_FCC,   params['w_fc_c'])
    w = put(w, ROW_FCM,   params['w_fc_m'])
    w = put(w, ROW_PRED,  params['w_pred'])
    w_slab = w.astype(jnp.bfloat16)

    b = jnp.zeros((8, 128), jnp.float32)
    b = b.at[0, 0:H3].set(bi[0])                      # bi (+ folded bh_r|bh_z)
    b = b.at[1, 0:H].set(bhn[0])                      # bh_n
    b = b.at[2, 0:NFC_LEFT].set(params['b_rnnfc'][0])
    b = b.at[3, 0:NFC_CENT].set(params['b_cfc'][0])
    b = b.at[4, 0:META_NFC_CENT].set(params['b_mfc'][0])
    b = b.at[5, 0:PRED_NFC].set(params['b_fc'][0])
    b = b.at[6, 0:PRED_OUT].set(params['b_pred'][0])
    return w_slab, b


# ---------------- fused Pallas kernel ----------------
def make_fused_kernel(T, S, B_pad, H):
    """T timesteps, S = 3*B_pad stacked+padded rows, H hidden units."""
    H3 = 3 * H
    E = SUM_EMB
    TS = T * S

    def kernel(x_ref, len_ref, w_ref, b_ref, o_ref, gi_ref):
        bias = b_ref[...]                                     # (8,128) f32 = 1 vreg

        # ---- hoisted input projection over ALL timesteps (one MXU pass) ----
        # gi_ref[t*S + s] = x[t, s] @ W_i + (b_i + [bh_r|bh_z|0])
        gi_ref[...] = (
            jnp.dot(x_ref[0:TS, 0:E], w_ref[ROW_WI:ROW_WI + E, 0:H3],
                    preferred_element_type=jnp.float32)
            + bias[0:1, 0:H3])

        wh = w_ref[ROW_WH:ROW_WH + H, 0:H3]                   # (H, 3H) bf16
        bhn = jnp.broadcast_to(bias[1:2, 0:H], (S, H))        # hoisted out of loop
        last_t = len_ref[...] - 1                             # (S, 1) int32

        # ---- GRU recurrence, fully unrolled (serial chain, state in vregs) ----
        h = jnp.zeros((S, H), jnp.float32)
        h_last = jnp.zeros((S, H), jnp.float32)
        for t in range(T):
            gi = gi_ref[t * S:(t + 1) * S, :]                 # (S, 3H) f32
            gh = jnp.dot(h.astype(jnp.bfloat16), wh,
                         preferred_element_type=jnp.float32)  # (S, 3H)
            rz = jax.nn.sigmoid(gi[:, 0:2 * H] + gh[:, 0:2 * H])   # fused r|z
            r = rz[:, 0:H]
            z = rz[:, H:2 * H]
            n = jnp.tanh(gi[:, 2 * H:H3] + r * (gh[:, 2 * H:H3] + bhn))
            h = n + z * (h - n)                               # == (1-z)*n + z*h
            h_last = jnp.where(last_t == t, h, h_last)

        # ---- fused head (epilogue) ----
        h_b = h_last.astype(jnp.bfloat16)
        sl  = h_b[0:B_pad]                 # self_left features
        plf = h_b[B_pad:2 * B_pad]         # partner_left  (recover_idx applied on input)
        prf = h_b[2 * B_pad:3 * B_pad]     # partner_right (recover_idx applied on input)

        # rnn_fc on concat([sl, plf, prf]) expressed as split-weight sum
        rnn_f = (
            jnp.dot(sl,  w_ref[ROW_RNNFC        :ROW_RNNFC + H,     0:NFC_LEFT],
                    preferred_element_type=jnp.float32)
            + jnp.dot(plf, w_ref[ROW_RNNFC + H  :ROW_RNNFC + 2 * H, 0:NFC_LEFT],
                      preferred_element_type=jnp.float32)
            + jnp.dot(prf, w_ref[ROW_RNNFC + 2 * H:ROW_RNNFC + 3 * H, 0:NFC_LEFT],
                      preferred_element_type=jnp.float32)
            + bias[2:3, 0:NFC_LEFT])

        # central + meta features (their rows ride in the tail of the x slab)
        cm = x_ref[TS:TS + 2 * B_pad, 0:E]                    # (2*B_pad, E) bf16
        cent = cm[0:B_pad, :]                                 # (B_pad, E)
        meta = cm[B_pad:2 * B_pad, :]                         # (B_pad, E), cols >= NEMB_META are 0
        cent_f = (jnp.dot(cent, w_ref[ROW_CFC:ROW_CFC + E, 0:NFC_CENT],
                          preferred_element_type=jnp.float32)
                  + bias[3:4, 0:NFC_CENT])
        meta_f = (jnp.dot(meta, w_ref[ROW_MFC:ROW_MFC + E, 0:META_NFC_CENT],
                          preferred_element_type=jnp.float32)
                  + bias[4:5, 0:META_NFC_CENT])

        # fc(concat(rnn_f, cent_f, meta_f)) + ReLU as split-weight sum
        hidden = jnp.maximum(
            jnp.dot(rnn_f.astype(jnp.bfloat16),
                    w_ref[ROW_FCL:ROW_FCL + NFC_LEFT, 0:PRED_NFC],
                    preferred_element_type=jnp.float32)
            + jnp.dot(cent_f.astype(jnp.bfloat16),
                      w_ref[ROW_FCC:ROW_FCC + NFC_CENT, 0:PRED_NFC],
                      preferred_element_type=jnp.float32)
            + jnp.dot(meta_f.astype(jnp.bfloat16),
                      w_ref[ROW_FCM:ROW_FCM + META_NFC_CENT, 0:PRED_NFC],
                      preferred_element_type=jnp.float32)
            + bias[5:6, 0:PRED_NFC], 0.0)

        o_ref[...] = (jnp.dot(hidden.astype(jnp.bfloat16),
                              w_ref[ROW_PRED:ROW_PRED + PRED_NFC, 0:PRED_OUT],
                              preferred_element_type=jnp.float32)
                      + bias[6:7, 0:PRED_OUT])

    return kernel


# ---------------- embeddings (plain-JAX glue) ----------------
def embed_tokens(params, tokens):
    # tokens: (..., num_token_streams) int32 -> (..., SUM_EMB) f32
    return jnp.concatenate(
        [params['emb_tables'][i][tokens[..., i]] for i in range(len(NUM_TOKENS))],
        axis=-1)


# ---------------- forward (single pallas_call) ----------------
def bachhm_forward(params, w_slab, b_slab, inputs):
    (self_left, self_length,
     partner_left, p_left_length, p_left_recover_idx,
     partner_central, meta_central,
     partner_right, p_right_length, p_right_recover_idx) = inputs

    B, T = self_left.shape[0], self_left.shape[1]
    B_pad = _round_up(B, 8)          # sublane-aligned rows per stream
    S = 3 * B_pad                    # stacked batch rows
    E = SUM_EMB

    # --- embed + apply recover_idx on the input side (GRU is row-independent) ---
    x_self  = embed_tokens(params, self_left)
    x_left  = embed_tokens(params, partner_left)[p_left_recover_idx]
    x_right = embed_tokens(params, partner_right)[p_right_recover_idx]
    l_self  = self_length.astype(jnp.int32)
    l_left  = p_left_length.astype(jnp.int32)[p_left_recover_idx]
    l_right = p_right_length.astype(jnp.int32)[p_right_recover_idx]

    pad_r = B_pad - B

    def pad_rows3(a):
        return jnp.pad(a, ((0, pad_r), (0, 0), (0, 0)))

    def pad_len(l):
        return jnp.pad(l, (0, pad_r), constant_values=1)

    # stacked batch: rows [0,B_pad)=self, [B_pad,2B_pad)=left, [2B_pad,3B_pad)=right
    x_all = jnp.concatenate([pad_rows3(x_self), pad_rows3(x_left),
                             pad_rows3(x_right)], axis=0)               # (S, T, E)
    x_tse = jnp.transpose(x_all, (1, 0, 2)).reshape(T * S, E)           # time-major

    cent = embed_tokens(params, partner_central)                        # (B, E)
    meta = params['meta_table'][meta_central]                           # (B, M)
    cent = jnp.pad(cent, ((0, pad_r), (0, 0)))
    meta = jnp.pad(meta, ((0, pad_r), (0, E - NEMB_META)))              # pad cols to E

    # single packed bf16 input slab: sequences | central rows | meta rows
    x_packed = jnp.concatenate([x_tse, cent, meta], axis=0).astype(jnp.bfloat16)
    lens = jnp.concatenate([pad_len(l_self), pad_len(l_left),
                            pad_len(l_right)]).reshape(S, 1)

    kernel = make_fused_kernel(T, S, B_pad, NHID)
    out = pl.pallas_call(
        kernel,
        out_shape=jax.ShapeDtypeStruct((B_pad, PRED_OUT), jnp.float32),
        in_specs=[pl.BlockSpec(memory_space=pltpu.MemorySpace.VMEM)] * 4,
        out_specs=pl.BlockSpec(memory_space=pltpu.MemorySpace.VMEM),
        scratch_shapes=[pltpu.VMEM((T * S, 3 * NHID), jnp.float32)],
    )(x_packed, lens, w_slab, b_slab)
    return out[:B], None


bachhm_forward_jit = jax.jit(bachhm_forward)


# ---------------- pure-JAX reference (for verification) ----------------
def _hp(a, b):
    return jnp.dot(a, b, precision=jax.lax.Precision.HIGHEST)


def ref_gru_last(params, tokens, lengths):
    x = embed_tokens(params, tokens).astype(jnp.float32)      # (B, T, E)
    g = params['gru']

    def step(h, x_t):
        r = jax.nn.sigmoid(_hp(x_t, g['wir']) + g['bir'][0] + _hp(h, g['whr']) + g['bhr'][0])
        z = jax.nn.sigmoid(_hp(x_t, g['wiz']) + g['biz'][0] + _hp(h, g['whz']) + g['bhz'][0])
        n = jnp.tanh(_hp(x_t, g['win']) + g['bin'][0] + r * (_hp(h, g['whn']) + g['bhn'][0]))
        h_new = (1.0 - z) * n + z * h
        return h_new, h_new

    h0 = jnp.zeros((x.shape[0], NHID), jnp.float32)
    _, hs = jax.lax.scan(step, h0, jnp.transpose(x, (1, 0, 2)))   # (T, B, H)
    return hs[lengths - 1, jnp.arange(x.shape[0])]


def ref_forward(params, inputs):
    (self_left, self_length,
     partner_left, p_left_length, p_left_recover_idx,
     partner_central, meta_central,
     partner_right, p_right_length, p_right_recover_idx) = inputs

    plf = ref_gru_last(params, partner_left, p_left_length)[p_left_recover_idx]
    prf = ref_gru_last(params, partner_right, p_right_length)[p_right_recover_idx]
    slf = ref_gru_last(params, self_left, self_length)
    rnn_cat = jnp.concatenate([slf, plf, prf], axis=-1)

    rnn_f = _hp(rnn_cat, params['w_rnnfc']) + params['b_rnnfc'][0]
    cent_f = _hp(embed_tokens(params, partner_central), params['w_cfc']) + params['b_cfc'][0]
    meta_f = _hp(params['meta_table'][meta_central], params['w_mfc']) + params['b_mfc'][0]
    hidden = jax.nn.relu(_hp(rnn_f, params['w_fc_l'])
                         + _hp(cent_f, params['w_fc_c'])
                         + _hp(meta_f, params['w_fc_m'])
                         + params['b_fc'][0])
    return _hp(hidden, params['w_pred']) + params['b_pred'][0]


# ---------------- deterministic parameter init ----------------
def init_params(key):
    keys = iter(jax.random.split(key, 32))

    def w(shape):
        return jax.random.normal(next(keys), shape, jnp.float32) * 0.1

    p = {}
    p['emb_tables'] = [w((NUM_TOKENS[i], NEMBS[i])) for i in range(len(NUM_TOKENS))]
    p['meta_table'] = w((16, NEMB_META))
    gru = {}
    for n in ('wir', 'wiz', 'win'):
        gru[n] = w((SUM_EMB, NHID))
    for n in ('whr', 'whz', 'whn'):
        gru[n] = w((NHID, NHID))
    for n in ('bir', 'biz', 'bin', 'bhr', 'bhz', 'bhn'):
        gru[n] = w((1, NHID))
    p['gru'] = gru
    p['w_rnnfc'] = w((3 * NHID, NFC_LEFT)); p['b_rnnfc'] = w((1, NFC_LEFT))
    p['w_cfc'] = w((SUM_EMB, NFC_CENT));    p['b_cfc'] = w((1, NFC_CENT))
    p['w_mfc'] = w((NEMB_META, META_NFC_CENT)); p['b_mfc'] = w((1, META_NFC_CENT))
    p['w_fc_l'] = w((NFC_LEFT, PRED_NFC))
    p['w_fc_c'] = w((NFC_CENT, PRED_NFC))
    p['w_fc_m'] = w((META_NFC_CENT, PRED_NFC))
    p['b_fc'] = w((1, PRED_NFC))
    p['w_pred'] = w((PRED_NFC, PRED_OUT)); p['b_pred'] = w((1, PRED_OUT))
    return p


# ---------------- main ----------------
if __name__ == "__main__":
    key = jax.random.PRNGKey(0)
    kp, kd = jax.random.split(key)
    params = init_params(kp)
    # one-time weight/bias packing (cached across forward calls)
    w_slab, b_slab = pack_params(params)

    B, T = 4, 8
    dks = iter(jax.random.split(kd, 16))

    def rand_tokens(shape_prefix):
        return jnp.stack(
            [jax.random.randint(next(dks), shape_prefix, 0, NUM_TOKENS[i], jnp.int32)
             for i in range(len(NUM_TOKENS))], axis=-1)

    self_left = rand_tokens((B, T))
    self_length = jnp.array([8, 6, 4, 2], jnp.int32)            # sorted (pack order)
    partner_left = rand_tokens((B, T))
    p_left_length = jnp.array([8, 7, 5, 3], jnp.int32)
    p_left_recover_idx = jnp.array([2, 0, 3, 1], jnp.int32)
    partner_central = rand_tokens((B,))
    meta_central = jax.random.randint(next(dks), (B,), 0, 16, jnp.int32)
    partner_right = rand_tokens((B, T))
    p_right_length = jnp.array([8, 5, 5, 2], jnp.int32)
    p_right_recover_idx = jnp.array([1, 3, 0, 2], jnp.int32)

    inputs = (self_left, self_length,
              partner_left, p_left_length, p_left_recover_idx,
              partner_central, meta_central,
              partner_right, p_right_length, p_right_recover_idx)

    pred, _ = bachhm_forward_jit(params, w_slab, b_slab, inputs)
    pred = jax.block_until_ready(pred)

    ref = jax.block_until_ready(ref_forward(params, inputs))
    # bf16 MXU operands (f32 accumulation) -> compare against the f32 HIGHEST
    # reference with a bf16-appropriate tolerance.
    np.testing.assert_allclose(np.asarray(pred), np.asarray(ref),
                               rtol=2e-2, atol=2e-2)
    assert pred.shape == (B, PRED_OUT)
    print("KERNEL_OK")
</pallas_src>

<mosaic_0001>
module attributes {stable_mosaic.version = 11 : i64} {
  func.func @kernel(%arg0: memref<208x16xbf16, #tpu.memory_space<vmem>>, %arg1: memref<24x1xi32, #tpu.memory_space<vmem>>, %arg2: memref<272x128xbf16, #tpu.memory_space<vmem>>, %arg3: memref<8x128xf32, #tpu.memory_space<vmem>>, %arg4: memref<8x128xf32, #tpu.memory_space<vmem>>, %arg5: memref<192x96xf32, #tpu.memory_space<vmem>>) attributes {dimension_semantics = [], scalar_prefetch = 0 : i64, scratch_operands = 1 : i64, tpu.core_type = #tpu.core_type<tc>} {
    %c0 = arith.constant 0 : index
    %c0_0 = arith.constant 0 : index
    %0 = vector.load %arg3[%c0, %c0_0] : memref<8x128xf32, #tpu.memory_space<vmem>>, vector<8x128xf32>
    %c0_1 = arith.constant 0 : index
    %c0_2 = arith.constant 0 : index
    %1 = vector.load %arg0[%c0_1, %c0_2] : memref<208x16xbf16, #tpu.memory_space<vmem>>, vector<192x16xbf16>
    %c0_3 = arith.constant 0 : index
    %c0_4 = arith.constant 0 : index
    %2 = vector.load %arg2[%c0_3, %c0_4] : memref<272x128xbf16, #tpu.memory_space<vmem>>, vector<16x96xbf16>
    %cst = arith.constant dense<0.000000e+00> : vector<192x96xf32>
    %3 = tpu.matmul %1, %2, %cst {dimension_numbers = #tpu.dot_dimension_numbers<[1], [0], [0], [1], [0, 0, 1, 1], [], []>} : vector<192x16xbf16>, vector<16x96xbf16>, vector<192x96xf32> -> vector<192x96xf32>
    %4 = vector.extract_strided_slice %0 {offsets = [0, 0], sizes = [1, 96], strides = [1, 1]} : vector<8x128xf32> to vector<1x96xf32>
    %5 = vector.broadcast %4 : vector<1x96xf32> to vector<192x96xf32>
    %6 = arith.addf %3, %5 : vector<192x96xf32>
    %c0_5 = arith.constant 0 : index
    %c0_6 = arith.constant 0 : index
    %7 = vector.load %arg5[%c0_5, %c0_6] : memref<192x96xf32, #tpu.memory_space<vmem>>, vector<192x96xf32>
    tpu.vector_store %arg5[%c0_5, %c0_6], %6 {strides = array<i32>} : memref<192x96xf32, #tpu.memory_space<vmem>>, vector<192x96xf32>,
    %c16 = arith.constant 16 : index
    %c0_7 = arith.constant 0 : index
    %8 = vector.load %arg2[%c16, %c0_7] : memref<272x128xbf16, #tpu.memory_space<vmem>>, vector<32x96xbf16>
    %9 = vector.extract_strided_slice %0 {offsets = [1, 0], sizes = [1, 32], strides = [1, 1]} : vector<8x128xf32> to vector<1x32xf32>
    %10 = vector.shape_cast %9 : vector<1x32xf32> to vector<1x32xf32>
    %11 = vector.broadcast %10 : vector<1x32xf32> to vector<24x32xf32>
    %c0_8 = arith.constant 0 : index
    %c0_9 = arith.constant 0 : index
    %12 = vector.load %arg1[%c0_8, %c0_9] : memref<24x1xi32, #tpu.memory_space<vmem>>, vector<24x1xi32>
    %c1_i32 = arith.constant 1 : i32
    %13 = vector.broadcast %c1_i32 : i32 to vector<24x1xi32>
    %14 = arith.subi %12, %13 : vector<24x1xi32>
    %cst_10 = arith.constant 0.000000e+00 : f32
    %15 = vector.broadcast %cst_10 : f32 to vector<24x32xf32>
    %cst_11 = arith.constant 0.000000e+00 : f32
    %16 = vector.broadcast %cst_11 : f32 to vector<24x32xf32>
    %c0_12 = arith.constant 0 : index
    %c0_13 = arith.constant 0 : index
    %17 = vector.load %arg5[%c0_12, %c0_13] : memref<192x96xf32, #tpu.memory_space<vmem>>, vector<24x96xf32>
    %18 = arith.truncf %15 : vector<24x32xf32> to vector<24x32xbf16>
    %cst_14 = arith.constant dense<0.000000e+00> : vector<24x96xf32>
    %19 = tpu.matmul %18, %8, %cst_14 {dimension_numbers = #tpu.dot_dimension_numbers<[1], [0], [0], [1], [0, 0, 1, 1], [], []>} : vector<24x32xbf16>, vector<32x96xbf16>, vector<24x96xf32> -> vector<24x96xf32>
    %20 = vector.extract_strided_slice %17 {offsets = [0, 0], sizes = [24, 64], strides = [1, 1]} : vector<24x96xf32> to vector<24x64xf32>
    %21 = vector.extract_strided_slice %19 {offsets = [0, 0], sizes = [24, 64], strides = [1, 1]} : vector<24x96xf32> to vector<24x64xf32>
    %22 = arith.addf %20, %21 : vector<24x64xf32>
    %23 = arith.negf %22 : vector<24x64xf32>
    %24 = math.exp %23 : vector<24x64xf32>
    %cst_15 = arith.constant 1.000000e+00 : f32
    %25 = vector.broadcast %cst_15 : f32 to vector<24x64xf32>
    %26 = arith.addf %25, %24 : vector<24x64xf32>
    %27 = arith.divf %25, %26 : vector<24x64xf32>
    %28 = vector.extract_strided_slice %27 {offsets = [0, 0], sizes = [24, 32], strides = [1, 1]} : vector<24x64xf32> to vector<24x32xf32>
    %29 = vector.extract_strided_slice %27 {offsets = [0, 32], sizes = [24, 32], strides = [1, 1]} : vector<24x64xf32> to vector<24x32xf32>
    %30 = vector.extract_strided_slice %17 {offsets = [0, 64], sizes = [24, 32], strides = [1, 1]} : vector<24x96xf32> to vector<24x32xf32>
    %31 = vector.extract_strided_slice %19 {offsets = [0, 64], sizes = [24, 32], strides = [1, 1]} : vector<24x96xf32> to vector<24x32xf32>
    %32 = arith.addf %31, %11 : vector<24x32xf32>
    %33 = arith.mulf %28, %32 : vector<24x32xf32>
    %34 = arith.addf %30, %33 : vector<24x32xf32>
    %35 = math.tanh %34 : vector<24x32xf32>
    %36 = arith.subf %15, %35 : vector<24x32xf32>
    %37 = arith.mulf %29, %36 : vector<24x32xf32>
    %38 = arith.addf %35, %37 : vector<24x32xf32>
    %c0_i32 = arith.constant 0 : i32
    %39 = vector.broadcast %c0_i32 : i32 to vector<24x1xi32>
    %40 = arith.cmpi eq, %14, %39 : vector<24x1xi32>
    %41 = vector.shape_cast %40 : vector<24x1xi1> to vector<24x1xi1>
    %42 = vector.broadcast %41 : vector<24x1xi1> to vector<24x32xi1>
    %43 = arith.select %42, %38, %16 : vector<24x32xi1>, vector<24x32xf32>
    %c24 = arith.constant 24 : index
    %c0_16 = arith.constant 0 : index
    %44 = vector.load %arg5[%c24, %c0_16] : memref<192x96xf32, #tpu.memory_space<vmem>>, vector<24x96xf32>
    %45 = arith.truncf %38 : vector<24x32xf32> to vector<24x32xbf16>
    %cst_17 = arith.constant dense<0.000000e+00> : vector<24x96xf32>
    %46 = tpu.matmul %45, %8, %cst_17 {dimension_numbers = #tpu.dot_dimension_numbers<[1], [0], [0], [1], [0, 0, 1, 1], [], []>} : vector<24x32xbf16>, vector<32x96xbf16>, vector<24x96xf32> -> vector<24x96xf32>
    %47 = vector.extract_strided_slice %44 {offsets = [0, 0], sizes = [24, 64], strides = [1, 1]} : vector<24x96xf32> to vector<24x64xf32>
    %48 = vector.extract_strided_slice %46 {offsets = [0, 0], sizes = [24, 64], strides = [1, 1]} : vector<24x96xf32> to vector<24x64xf32>
    %49 = arith.addf %47, %48 : vector<24x64xf32>
    %50 = arith.negf %49 : vector<24x64xf32>
    %51 = math.exp %50 : vector<24x64xf32>
    %cst_18 = arith.constant 1.000000e+00 : f32
    %52 = vector.broadcast %cst_18 : f32 to vector<24x64xf32>
    %53 = arith.addf %52, %51 : vector<24x64xf32>
    %54 = arith.divf %52, %53 : vector<24x64xf32>
    %55 = vector.extract_strided_slice %54 {offsets = [0, 0], sizes = [24, 32], strides = [1, 1]} : vector<24x64xf32> to vector<24x32xf32>
    %56 = vector.extract_strided_slice %54 {offsets = [0, 32], sizes = [24, 32], strides = [1, 1]} : vector<24x64xf32> to vector<24x32xf32>
    %57 = vector.extract_strided_slice %44 {offsets = [0, 64], sizes = [24, 32], strides = [1, 1]} : vector<24x96xf32> to vector<24x32xf32>
    %58 = vector.extract_strided_slice %46 {offsets = [0, 64], sizes = [24, 32], strides = [1, 1]} : vector<24x96xf32> to vector<24x32xf32>
    %59 = arith.addf %58, %11 : vector<24x32xf32>
    %60 = arith.mulf %55, %59 : vector<24x32xf32>
    %61 = arith.addf %57, %60 : vector<24x32xf32>
    %62 = math.tanh %61 : vector<24x32xf32>
    %63 = arith.subf %38, %62 : vector<24x32xf32>
    %64 = arith.mulf %56, %63 : vector<24x32xf32>
    %65 = arith.addf %62, %64 : vector<24x32xf32>
    %c1_i32_19 = arith.constant 1 : i32
    %66 = vector.broadcast %c1_i32_19 : i32 to vector<24x1xi32>
    %67 = arith.cmpi eq, %14, %66 : vector<24x1xi32>
    %68 = vector.shape_cast %67 : vector<24x1xi1> to vector<24x1xi1>
    %69 = vector.broadcast %68 : vector<24x1xi1> to vector<24x32xi1>
    %70 = arith.select %69, %65, %43 : vector<24x32xi1>, vector<24x32xf32>
    %c48 = arith.constant 48 : index
    %c0_20 = arith.constant 0 : index
    %71 = vector.load %arg5[%c48, %c0_20] : memref<192x96xf32, #tpu.memory_space<vmem>>, vector<24x96xf32>
    %72 = arith.truncf %65 : vector<24x32xf32> to vector<24x32xbf16>
    %cst_21 = arith.constant dense<0.000000e+00> : vector<24x96xf32>
    %73 = tpu.matmul %72, %8, %cst_21 {dimension_numbers = #tpu.dot_dimension_numbers<[1], [0], [0], [1], [0, 0, 1, 1], [], []>} : vector<24x32xbf16>, vector<32x96xbf16>, vector<24x96xf32> -> vector<24x96xf32>
    %74 = vector.extract_strided_slice %71 {offsets = [0, 0], sizes = [24, 64], strides = [1, 1]} : vector<24x96xf32> to vector<24x64xf32>
    %75 = vector.extract_strided_slice %73 {offsets = [0, 0], sizes = [24, 64], strides = [1, 1]} : vector<24x96xf32> to vector<24x64xf32>
    %76 = arith.addf %74, %75 : vector<24x64xf32>
    %77 = arith.negf %76 : vector<24x64xf32>
    %78 = math.exp %77 : vector<24x64xf32>
    %cst_22 = arith.constant 1.000000e+00 : f32
    %79 = vector.broadcast %cst_22 : f32 to vector<24x64xf32>
    %80 = arith.addf %79, %78 : vector<24x64xf32>
    %81 = arith.divf %79, %80 : vector<24x64xf32>
    %82 = vector.extract_strided_slice %81 {offsets = [0, 0], sizes = [24, 32], strides = [1, 1]} : vector<24x64xf32> to vector<24x32xf32>
    %83 = vector.extract_strided_slice %81 {offsets = [0, 32], sizes = [24, 32], strides = [1, 1]} : vector<24x64xf32> to vector<24x32xf32>
    %84 = vector.extract_strided_slice %71 {offsets = [0, 64], sizes = [24, 32], strides = [1, 1]} : vector<24x96xf32> to vector<24x32xf32>
    %85 = vector.extract_strided_slice %73 {offsets = [0, 64], sizes = [24, 32], strides = [1, 1]} : vector<24x96xf32> to vector<24x32xf32>
    %86 = arith.addf %85, %11 : vector<24x32xf32>
    %87 = arith.mulf %82, %86 : vector<24x32xf32>
    %88 = arith.addf %84, %87 : vector<24x32xf32>
    %89 = math.tanh %88 : vector<24x32xf32>
    %90 = arith.subf %65, %89 : vector<24x32xf32>
    %91 = arith.mulf %83, %90 : vector<24x32xf32>
    %92 = arith.addf %89, %91 : vector<24x32xf32>
    %c2_i32 = arith.constant 2 : i32
    %93 = vector.broadcast %c2_i32 : i32 to vector<24x1xi32>
    %94 = arith.cmpi eq, %14, %93 : vector<24x1xi32>
    %95 = vector.shape_cast %94 : vector<24x1xi1> to vector<24x1xi1>
    %96 = vector.broadcast %95 : vector<24x1xi1> to vector<24x32xi1>
    %97 = arith.select %96, %92, %70 : vector<24x32xi1>, vector<24x32xf32>
    %c72 = arith.constant 72 : index
    %c0_23 = arith.constant 0 : index
    %98 = vector.load %arg5[%c72, %c0_23] : memref<192x96xf32, #tpu.memory_space<vmem>>, vector<24x96xf32>
    %99 = arith.truncf %92 : vector<24x32xf32> to vector<24x32xbf16>
    %cst_24 = arith.constant dense<0.000000e+00> : vector<24x96xf32>
    %100 = tpu.matmul %99, %8, %cst_24 {dimension_numbers = #tpu.dot_dimension_numbers<[1], [0], [0], [1], [0, 0, 1, 1], [], []>} : vector<24x32xbf16>, vector<32x96xbf16>, vector<24x96xf32> -> vector<24x96xf32>
    %101 = vector.extract_strided_slice %98 {offsets = [0, 0], sizes = [24, 64], strides = [1, 1]} : vector<24x96xf32> to vector<24x64xf32>
    %102 = vector.extract_strided_slice %100 {offsets = [0, 0], sizes = [24, 64], strides = [1, 1]} : vector<24x96xf32> to vector<24x64xf32>
    %103 = arith.addf %101, %102 : vector<24x64xf32>
    %104 = arith.negf %103 : vector<24x64xf32>
    %105 = math.exp %104 : vector<24x64xf32>
    %cst_25 = arith.constant 1.000000e+00 : f32
    %106 = vector.broadcast %cst_25 : f32 to vector<24x64xf32>
    %107 = arith.addf %106, %105 : vector<24x64xf32>
    %108 = arith.divf %106, %107 : vector<24x64xf32>
    %109 = vector.extract_strided_slice %108 {offsets = [0, 0], sizes = [24, 32], strides = [1, 1]} : vector<24x64xf32> to vector<24x32xf32>
    %110 = vector.extract_strided_slice %108 {offsets = [0, 32], sizes = [24, 32], strides = [1, 1]} : vector<24x64xf32> to vector<24x32xf32>
    %111 = vector.extract_strided_slice %98 {offsets = [0, 64], sizes = [24, 32], strides = [1, 1]} : vector<24x96xf32> to vector<24x32xf32>
    %112 = vector.extract_strided_slice %100 {offsets = [0, 64], sizes = [24, 32], strides = [1, 1]} : vector<24x96xf32> to vector<24x32xf32>
    %113 = arith.addf %112, %11 : vector<24x32xf32>
    %114 = arith.mulf %109, %113 : vector<24x32xf32>
    %115 = arith.addf %111, %114 : vector<24x32xf32>
    %116 = math.tanh %115 : vector<24x32xf32>
    %117 = arith.subf %92, %116 : vector<24x32xf32>
    %118 = arith.mulf %110, %117 : vector<24x32xf32>
    %119 = arith.addf %116, %118 : vector<24x32xf32>
    %c3_i32 = arith.constant 3 : i32
    %120 = vector.broadcast %c3_i32 : i32 to vector<24x1xi32>
    %121 = arith.cmpi eq, %14, %120 : vector<24x1xi32>
    %122 = vector.shape_cast %121 : vector<24x1xi1> to vector<24x1xi1>
    %123 = vector.broadcast %122 : vector<24x1xi1> to vector<24x32xi1>
    %124 = arith.select %123, %119, %97 : vector<24x32xi1>, vector<24x32xf32>
    %c96 = arith.constant 96 : index
    %c0_26 = arith.constant 0 : index
    %125 = vector.load %arg5[%c96, %c0_26] : memref<192x96xf32, #tpu.memory_space<vmem>>, vector<24x96xf32>
    %126 = arith.truncf %119 : vector<24x32xf32> to vector<24x32xbf16>
    %cst_27 = arith.constant dense<0.000000e+00> : vector<24x96xf32>
    %127 = tpu.matmul %126, %8, %cst_27 {dimension_numbers = #tpu.dot_dimension_numbers<[1], [0], [0], [1], [0, 0, 1, 1], [], []>} : vector<24x32xbf16>, vector<32x96xbf16>, vector<24x96xf32> -> vector<24x96xf32>
    %128 = vector.extract_strided_slice %125 {offsets = [0, 0], sizes = [24, 64], strides = [1, 1]} : vector<24x96xf32> to vector<24x64xf32>
    %129 = vector.extract_strided_slice %127 {offsets = [0, 0], sizes = [24, 64], strides = [1, 1]} : vector<24x96xf32> to vector<24x64xf32>
    %130 = arith.addf %128, %129 : vector<24x64xf32>
    %131 = arith.negf %130 : vector<24x64xf32>
    %132 = math.exp %131 : vector<24x64xf32>
    %cst_28 = arith.constant 1.000000e+00 : f32
    %133 = vector.broadcast %cst_28 : f32 to vector<24x64xf32>
    %134 = arith.addf %133, %132 : vector<24x64xf32>
    %135 = arith.divf %133, %134 : vector<24x64xf32>
    %136 = vector.extract_strided_slice %135 {offsets = [0, 0], sizes = [24, 32], strides = [1, 1]} : vector<24x64xf32> to vector<24x32xf32>
    %137 = vector.extract_strided_slice %135 {offsets = [0, 32], sizes = [24, 32], strides = [1, 1]} : vector<24x64xf32> to vector<24x32xf32>
    %138 = vector.extract_strided_slice %125 {offsets = [0, 64], sizes = [24, 32], strides = [1, 1]} : vector<24x96xf32> to vector<24x32xf32>
    %139 = vector.extract_strided_slice %127 {offsets = [0, 64], sizes = [24, 32], strides = [1, 1]} : vector<24x96xf32> to vector<24x32xf32>
    %140 = arith.addf %139, %11 : vector<24x32xf32>
    %141 = arith.mulf %136, %140 : vector<24x32xf32>
    %142 = arith.addf %138, %141 : vector<24x32xf32>
    %143 = math.tanh %142 : vector<24x32xf32>
    %144 = arith.subf %119, %143 : vector<24x32xf32>
    %145 = arith.mulf %137, %144 : vector<24x32xf32>
    %146 = arith.addf %143, %145 : vector<24x32xf32>
    %c4_i32 = arith.constant 4 : i32
    %147 = vector.broadcast %c4_i32 : i32 to vector<24x1xi32>
    %148 = arith.cmpi eq, %14, %147 : vector<24x1xi32>
    %149 = vector.shape_cast %148 : vector<24x1xi1> to vector<24x1xi1>
    %150 = vector.broadcast %149 : vector<24x1xi1> to vector<24x32xi1>
    %151 = arith.select %150, %146, %124 : vector<24x32xi1>, vector<24x32xf32>
    %c120 = arith.constant 120 : index
    %c0_29 = arith.constant 0 : index
    %152 = vector.load %arg5[%c120, %c0_29] : memref<192x96xf32, #tpu.memory_space<vmem>>, vector<24x96xf32>
    %153 = arith.truncf %146 : vector<24x32xf32> to vector<24x32xbf16>
    %cst_30 = arith.constant dense<0.000000e+00> : vector<24x96xf32>
    %154 = tpu.matmul %153, %8, %cst_30 {dimension_numbers = #tpu.dot_dimension_numbers<[1], [0], [0], [1], [0, 0, 1, 1], [], []>} : vector<24x32xbf16>, vector<32x96xbf16>, vector<24x96xf32> -> vector<24x96xf32>
    %155 = vector.extract_strided_slice %152 {offsets = [0, 0], sizes = [24, 64], strides = [1, 1]} : vector<24x96xf32> to vector<24x64xf32>
    %156 = vector.extract_strided_slice %154 {offsets = [0, 0], sizes = [24, 64], strides = [1, 1]} : vector<24x96xf32> to vector<24x64xf32>
    %157 = arith.addf %155, %156 : vector<24x64xf32>
    %158 = arith.negf %157 : vector<24x64xf32>
    %159 = math.exp %158 : vector<24x64xf32>
    %cst_31 = arith.constant 1.000000e+00 : f32
    %160 = vector.broadcast %cst_31 : f32 to vector<24x64xf32>
    %161 = arith.addf %160, %159 : vector<24x64xf32>
    %162 = arith.divf %160, %161 : vector<24x64xf32>
    %163 = vector.extract_strided_slice %162 {offsets = [0, 0], sizes = [24, 32], strides = [1, 1]} : vector<24x64xf32> to vector<24x32xf32>
    %164 = vector.extract_strided_slice %162 {offsets = [0, 32], sizes = [24, 32], strides = [1, 1]} : vector<24x64xf32> to vector<24x32xf32>
    %165 = vector.extract_strided_slice %152 {offsets = [0, 64], sizes = [24, 32], strides = [1, 1]} : vector<24x96xf32> to vector<24x32xf32>
    %166 = vector.extract_strided_slice %154 {offsets = [0, 64], sizes = [24, 32], strides = [1, 1]} : vector<24x96xf32> to vector<24x32xf32>
    %167 = arith.addf %166, %11 : vector<24x32xf32>
    %168 = arith.mulf %163, %167 : vector<24x32xf32>
    %169 = arith.addf %165, %168 : vector<24x32xf32>
    %170 = math.tanh %169 : vector<24x32xf32>
    %171 = arith.subf %146, %170 : vector<24x32xf32>
    %172 = arith.mulf %164, %171 : vector<24x32xf32>
    %173 = arith.addf %170, %172 : vector<24x32xf32>
    %c5_i32 = arith.constant 5 : i32
    %174 = vector.broadcast %c5_i32 : i32 to vector<24x1xi32>
    %175 = arith.cmpi eq, %14, %174 : vector<24x1xi32>
    %176 = vector.shape_cast %175 : vector<24x1xi1> to vector<24x1xi1>
    %177 = vector.broadcast %176 : vector<24x1xi1> to vector<24x32xi1>
    %178 = arith.select %177, %173, %151 : vector<24x32xi1>, vector<24x32xf32>
    %c144 = arith.constant 144 : index
    %c0_32 = arith.constant 0 : index
    %179 = vector.load %arg5[%c144, %c0_32] : memref<192x96xf32, #tpu.memory_space<vmem>>, vector<24x96xf32>
    %180 = arith.truncf %173 : vector<24x32xf32> to vector<24x32xbf16>
    %cst_33 = arith.constant dense<0.000000e+00> : vector<24x96xf32>
    %181 = tpu.matmul %180, %8, %cst_33 {dimension_numbers = #tpu.dot_dimension_numbers<[1], [0], [0], [1], [0, 0, 1, 1], [], []>} : vector<24x32xbf16>, vector<32x96xbf16>, vector<24x96xf32> -> vector<24x96xf32>
    %182 = vector.extract_strided_slice %179 {offsets = [0, 0], sizes = [24, 64], strides = [1, 1]} : vector<24x96xf32> to vector<24x64xf32>
    %183 = vector.extract_strided_slice %181 {offsets = [0, 0], sizes = [24, 64], strides = [1, 1]} : vector<24x96xf32> to vector<24x64xf32>
    %184 = arith.addf %182, %183 : vector<24x64xf32>
    %185 = arith.negf %184 : vector<24x64xf32>
    %186 = math.exp %185 : vector<24x64xf32>
    %cst_34 = arith.constant 1.000000e+00 : f32
    %187 = vector.broadcast %cst_34 : f32 to vector<24x64xf32>
    %188 = arith.addf %187, %186 : vector<24x64xf32>
    %189 = arith.divf %187, %188 : vector<24x64xf32>
    %190 = vector.extract_strided_slice %189 {offsets = [0, 0], sizes = [24, 32], strides = [1, 1]} : vector<24x64xf32> to vector<24x32xf32>
    %191 = vector.extract_strided_slice %189 {offsets = [0, 32], sizes = [24, 32], strides = [1, 1]} : vector<24x64xf32> to vector<24x32xf32>
    %192 = vector.extract_strided_slice %179 {offsets = [0, 64], sizes = [24, 32], strides = [1, 1]} : vector<24x96xf32> to vector<24x32xf32>
    %193 = vector.extract_strided_slice %181 {offsets = [0, 64], sizes = [24, 32], strides = [1, 1]} : vector<24x96xf32> to vector<24x32xf32>
    %194 = arith.addf %193, %11 : vector<24x32xf32>
    %195 = arith.mulf %190, %194 : vector<24x32xf32>
    %196 = arith.addf %192, %195 : vector<24x32xf32>
    %197 = math.tanh %196 : vector<24x32xf32>
    %198 = arith.subf %173, %197 : vector<24x32xf32>
    %199 = arith.mulf %191, %198 : vector<24x32xf32>
    %200 = arith.addf %197, %199 : vector<24x32xf32>
    %c6_i32 = arith.constant 6 : i32
    %201 = vector.broadcast %c6_i32 : i32 to vector<24x1xi32>
    %202 = arith.cmpi eq, %14, %201 : vector<24x1xi32>
    %203 = vector.shape_cast %202 : vector<24x1xi1> to vector<24x1xi1>
    %204 = vector.broadcast %203 : vector<24x1xi1> to vector<24x32xi1>
    %205 = arith.select %204, %200, %178 : vector<24x32xi1>, vector<24x32xf32>
    %c168 = arith.constant 168 : index
    %c0_35 = arith.constant 0 : index
    %206 = vector.load %arg5[%c168, %c0_35] : memref<192x96xf32, #tpu.memory_space<vmem>>, vector<24x96xf32>
    %207 = arith.truncf %200 : vector<24x32xf32> to vector<24x32xbf16>
    %cst_36 = arith.constant dense<0.000000e+00> : vector<24x96xf32>
    %208 = tpu.matmul %207, %8, %cst_36 {dimension_numbers = #tpu.dot_dimension_numbers<[1], [0], [0], [1], [0, 0, 1, 1], [], []>} : vector<24x32xbf16>, vector<32x96xbf16>, vector<24x96xf32> -> vector<24x96xf32>
    %209 = vector.extract_strided_slice %206 {offsets = [0, 0], sizes = [24, 64], strides = [1, 1]} : vector<24x96xf32> to vector<24x64xf32>
    %210 = vector.extract_strided_slice %208 {offsets = [0, 0], sizes = [24, 64], strides = [1, 1]} : vector<24x96xf32> to vector<24x64xf32>
    %211 = arith.addf %209, %210 : vector<24x64xf32>
    %212 = arith.negf %211 : vector<24x64xf32>
    %213 = math.exp %212 : vector<24x64xf32>
    %cst_37 = arith.constant 1.000000e+00 : f32
    %214 = vector.broadcast %cst_37 : f32 to vector<24x64xf32>
    %215 = arith.addf %214, %213 : vector<24x64xf32>
    %216 = arith.divf %214, %215 : vector<24x64xf32>
    %217 = vector.extract_strided_slice %216 {offsets = [0, 0], sizes = [24, 32], strides = [1, 1]} : vector<24x64xf32> to vector<24x32xf32>
    %218 = vector.extract_strided_slice %216 {offsets = [0, 32], sizes = [24, 32], strides = [1, 1]} : vector<24x64xf32> to vector<24x32xf32>
    %219 = vector.extract_strided_slice %206 {offsets = [0, 64], sizes = [24, 32], strides = [1, 1]} : vector<24x96xf32> to vector<24x32xf32>
    %220 = vector.extract_strided_slice %208 {offsets = [0, 64], sizes = [24, 32], strides = [1, 1]} : vector<24x96xf32> to vector<24x32xf32>
    %221 = arith.addf %220, %11 : vector<24x32xf32>
    %222 = arith.mulf %217, %221 : vector<24x32xf32>
    %223 = arith.addf %219, %222 : vector<24x32xf32>
    %224 = math.tanh %223 : vector<24x32xf32>
    %225 = arith.subf %200, %224 : vector<24x32xf32>
    %226 = arith.mulf %218, %225 : vector<24x32xf32>
    %227 = arith.addf %224, %226 : vector<24x32xf32>
    %c7_i32 = arith.constant 7 : i32
    %228 = vector.broadcast %c7_i32 : i32 to vector<24x1xi32>
    %229 = arith.cmpi eq, %14, %228 : vector<24x1xi32>
    %230 = vector.shape_cast %229 : vector<24x1xi1> to vector<24x1xi1>
    %231 = vector.broadcast %230 : vector<24x1xi1> to vector<24x32xi1>
    %232 = arith.select %231, %227, %205 : vector<24x32xi1>, vector<24x32xf32>
    %233 = arith.truncf %232 : vector<24x32xf32> to vector<24x32xbf16>
    %234 = vector.extract_strided_slice %233 {offsets = [0, 0], sizes = [8, 32], strides = [1, 1]} : vector<24x32xbf16> to vector<8x32xbf16>
    %235 = vector.extract_strided_slice %233 {offsets = [8, 0], sizes = [8, 32], strides = [1, 1]} : vector<24x32xbf16> to vector<8x32xbf16>
    %236 = vector.extract_strided_slice %233 {offsets = [16, 0], sizes = [8, 32], strides = [1, 1]} : vector<24x32xbf16> to vector<8x32xbf16>
    %c48_38 = arith.constant 48 : index
    %c0_39 = arith.constant 0 : index
    %237 = vector.load %arg2[%c48_38, %c0_39] : memref<272x128xbf16, #tpu.memory_space<vmem>>, vector<32x32xbf16>
    %cst_40 = arith.constant dense<0.000000e+00> : vector<8x32xf32>
    %238 = tpu.matmul %234, %237, %cst_40 {dimension_numbers = #tpu.dot_dimension_numbers<[1], [0], [0], [1], [0, 0, 1, 1], [], []>} : vector<8x32xbf16>, vector<32x32xbf16>, vector<8x32xf32> -> vector<8x32xf32>
    %c80 = arith.constant 80 : index
    %c0_41 = arith.constant 0 : index
    %239 = vector.load %arg2[%c80, %c0_41] : memref<272x128xbf16, #tpu.memory_space<vmem>>, vector<32x32xbf16>
    %cst_42 = arith.constant dense<0.000000e+00> : vector<8x32xf32>
    %240 = tpu.matmul %235, %239, %cst_42 {dimension_numbers = #tpu.dot_dimension_numbers<[1], [0], [0], [1], [0, 0, 1, 1], [], []>} : vector<8x32xbf16>, vector<32x32xbf16>, vector<8x32xf32> -> vector<8x32xf32>
    %241 = arith.addf %238, %240 : vector<8x32xf32>
    %c112 = arith.constant 112 : index
    %c0_43 = arith.constant 0 : index
    %242 = vector.load %arg2[%c112, %c0_43] : memref<272x128xbf16, #tpu.memory_space<vmem>>, vector<32x32xbf16>
    %cst_44 = arith.constant dense<0.000000e+00> : vector<8x32xf32>
    %243 = tpu.matmul %236, %242, %cst_44 {dimension_numbers = #tpu.dot_dimension_numbers<[1], [0], [0], [1], [0, 0, 1, 1], [], []>} : vector<8x32xbf16>, vector<32x32xbf16>, vector<8x32xf32> -> vector<8x32xf32>
    %244 = arith.addf %241, %243 : vector<8x32xf32>
    %245 = vector.extract_strided_slice %0 {offsets = [2, 0], sizes = [1, 32], strides = [1, 1]} : vector<8x128xf32> to vector<1x32xf32>
    %246 = vector.broadcast %245 : vector<1x32xf32> to vector<8x32xf32>
    %247 = arith.addf %244, %246 : vector<8x32xf32>
    %c192 = arith.constant 192 : index
    %c0_45 = arith.constant 0 : index
    %248 = vector.load %arg0[%c192, %c0_45] : memref<208x16xbf16, #tpu.memory_space<vmem>>, vector<16x16xbf16>
    %249 = vector.extract_strided_slice %248 {offsets = [0, 0], sizes = [8, 16], strides = [1, 1]} : vector<16x16xbf16> to vector<8x16xbf16>
    %250 = vector.extract_strided_slice %248 {offsets = [8, 0], sizes = [8, 16], strides = [1, 1]} : vector<16x16xbf16> to vector<8x16xbf16>
    %c144_46 = arith.constant 144 : index
    %c0_47 = arith.constant 0 : index
    %251 = vector.load %arg2[%c144_46, %c0_47] : memref<272x128xbf16, #tpu.memory_space<vmem>>, vector<16x16xbf16>
    %cst_48 = arith.constant dense<0.000000e+00> : vector<8x16xf32>
    %252 = tpu.matmul %249, %251, %cst_48 {dimension_numbers = #tpu.dot_dimension_numbers<[1], [0], [0], [1], [0, 0, 1, 1], [], []>} : vector<8x16xbf16>, vector<16x16xbf16>, vector<8x16xf32> -> vector<8x16xf32>
    %253 = vector.extract_strided_slice %0 {offsets = [3, 0], sizes = [1, 16], strides = [1, 1]} : vector<8x128xf32> to vector<1x16xf32>
    %254 = vector.broadcast %253 : vector<1x16xf32> to vector<8x16xf32>
    %255 = arith.addf %252, %254 : vector<8x16xf32>
    %c160 = arith.constant 160 : index
    %c0_49 = arith.constant 0 : index
    %256 = vector.load %arg2[%c160, %c0_49] : memref<272x128xbf16, #tpu.memory_space<vmem>>, vector<16x16xbf16>
    %cst_50 = arith.constant dense<0.000000e+00> : vector<8x16xf32>
    %257 = tpu.matmul %250, %256, %cst_50 {dimension_numbers = #tpu.dot_dimension_numbers<[1], [0], [0], [1], [0, 0, 1, 1], [], []>} : vector<8x16xbf16>, vector<16x16xbf16>, vector<8x16xf32> -> vector<8x16xf32>
    %258 = vector.extract_strided_slice %0 {offsets = [4, 0], sizes = [1, 16], strides = [1, 1]} : vector<8x128xf32> to vector<1x16xf32>
    %259 = vector.broadcast %258 : vector<1x16xf32> to vector<8x16xf32>
    %260 = arith.addf %257, %259 : vector<8x16xf32>
    %261 = arith.truncf %247 : vector<8x32xf32> to vector<8x32xbf16>
    %c176 = arith.constant 176 : index
    %c0_51 = arith.constant 0 : index
    %262 = vector.load %arg2[%c176, %c0_51] : memref<272x128xbf16, #tpu.memory_space<vmem>>, vector<32x32xbf16>
    %cst_52 = arith.constant dense<0.000000e+00> : vector<8x32xf32>
    %263 = tpu.matmul %261, %262, %cst_52 {dimension_numbers = #tpu.dot_dimension_numbers<[1], [0], [0], [1], [0, 0, 1, 1], [], []>} : vector<8x32xbf16>, vector<32x32xbf16>, vector<8x32xf32> -> vector<8x32xf32>
    %264 = arith.truncf %255 : vector<8x16xf32> to vector<8x16xbf16>
    %c208 = arith.constant 208 : index
    %c0_53 = arith.constant 0 : index
    %265 = vector.load %arg2[%c208, %c0_53] : memref<272x128xbf16, #tpu.memory_space<vmem>>, vector<16x32xbf16>
    %cst_54 = arith.constant dense<0.000000e+00> : vector<8x32xf32>
    %266 = tpu.matmul %264, %265, %cst_54 {dimension_numbers = #tpu.dot_dimension_numbers<[1], [0], [0], [1], [0, 0, 1, 1], [], []>} : vector<8x16xbf16>, vector<16x32xbf16>, vector<8x32xf32> -> vector<8x32xf32>
    %267 = arith.addf %263, %266 : vector<8x32xf32>
    %268 = arith.truncf %260 : vector<8x16xf32> to vector<8x16xbf16>
    %c224 = arith.constant 224 : index
    %c0_55 = arith.constant 0 : index
    %269 = vector.load %arg2[%c224, %c0_55] : memref<272x128xbf16, #tpu.memory_space<vmem>>, vector<16x32xbf16>
    %cst_56 = arith.constant dense<0.000000e+00> : vector<8x32xf32>
    %270 = tpu.matmul %268, %269, %cst_56 {dimension_numbers = #tpu.dot_dimension_numbers<[1], [0], [0], [1], [0, 0, 1, 1], [], []>} : vector<8x16xbf16>, vector<16x32xbf16>, vector<8x32xf32> -> vector<8x32xf32>
    %271 = arith.addf %267, %270 : vector<8x32xf32>
    %272 = vector.extract_strided_slice %0 {offsets = [5, 0], sizes = [1, 32], strides = [1, 1]} : vector<8x128xf32> to vector<1x32xf32>
    %273 = vector.broadcast %272 : vector<1x32xf32> to vector<8x32xf32>
    %274 = arith.addf %271, %273 : vector<8x32xf32>
    %cst_57 = arith.constant 0.000000e+00 : f32
    %275 = vector.broadcast %cst_57 : f32 to vector<8x32xf32>
    %276 = arith.maximumf %274, %275 : vector<8x32xf32>
    %277 = arith.truncf %276 : vector<8x32xf32> to vector<8x32xbf16>
    %c240 = arith.constant 240 : index
    %c0_58 = arith.constant 0 : index
    %278 = vector.load %arg2[%c240, %c0_58] : memref<272x128xbf16, #tpu.memory_space<vmem>>, vector<32x128xbf16>
    %cst_59 = arith.constant dense<0.000000e+00> : vector<8x128xf32>
    %279 = tpu.matmul %277, %278, %cst_59 {dimension_numbers = #tpu.dot_dimension_numbers<[1], [0], [0], [1], [0, 0, 1, 1], [], []>} : vector<8x32xbf16>, vector<32x128xbf16>, vector<8x128xf32> -> vector<8x128xf32>
    %280 = vector.extract_strided_slice %0 {offsets = [6, 0], sizes = [1, 128], strides = [1, 1]} : vector<8x128xf32> to vector<1x128xf32>
    %281 = vector.broadcast %280 : vector<1x128xf32> to vector<8x128xf32>
    %282 = arith.addf %279, %281 : vector<8x128xf32>
    %c0_60 = arith.constant 0 : index
    %c0_61 = arith.constant 0 : index
    %283 = vector.load %arg4[%c0_60, %c0_61] : memref<8x128xf32, #tpu.memory_space<vmem>>, vector<8x128xf32>
    tpu.vector_store %arg4[%c0_60, %c0_61], %282 {strides = array<i32>} : memref<8x128xf32, #tpu.memory_space<vmem>>, vector<8x128xf32>,
    return
  }
}

</mosaic_0001>

<bundles_post_ra>
// kernel: bachhm_forward.1
= control target key start
LH: loop header
LB: loop body
LE: loop exit
PB: predicated region body
PF: predicated region fallthrough
CT: control target
= control target key end

     0   :  { %v45_v0 = vlaneseq  ;;  %vm115_vm0 = vcmask 130048   ;;  %v2777_v2 = vmov 0   ;;  %s2778_s27 = smov 64   ;;  %vm281_vm1 = vcmask 785408   ;;  %s2779_s28 = smov 96   ;;  %s3388_s2 = inlined_call_operand.vmem [shape: bf16[272,128], index: 2, kind: input, shape index: {}]   ;;  %s3389_s0 = inlined_call_operand.vmem [shape: bf16[208,16], index: 0, kind: input, shape index: {}]   ;;  %s3390_s3 = inlined_call_operand.vmem [shape: f32[8,128], index: 3, kind: input, shape index: {}]   ;;  %s3391_s1 = inlined_call_operand.vmem [shape: s32[24,1], index: 1, kind: input, shape index: {}]   ;;  %s3392_s4 = inlined_call_operand.vmem [shape: f32[8,128], index: 4, kind: output, shape index: {}]  }
   0x1   :  { %v2601_v1 = vld [vmem:[%s3388_s2] sm:$0xff]   ;;  %2469 = vmatprep.mubr.bf16.mxu1 %v2777_v2  ;;  %2599 = vset.pattern.permute.xlu0 %v2777_v2  ;;  %v2816_v3 = vld [vmem:[%s3388_s2 + $0x8] sm:$0xff]   ;;  %v2833_v7 = vld [vmem:[%s3388_s2 + $0x10] sm:$0xff]   ;;  %s2780_s7 = smov 32   ;;  %vm335_vm2 = vcmask 261120  }
   0x2   :  { %v2818_v4 = vshrl.u32 %v45_v0, 7  ;;  %2600 = vset.pattern.permute.xlu1 %v2777_v2  ;;  %2439 = vmatprep.subr.bf16.mxu0 %v2601_v1  ;;  %v2603_v5 = vld [vmem:[%s3389_s0] sm:$0xff]   ;;  %v2604_v6 = vld [vmem:[%s3389_s0 + $0x8] sm:$0xff]  }
   0x3   :  { %2465 = vmatprep.subr.bf16.mxu1 %v2816_v3  ;;  %2440 = vmatpush3.bf16.msra.mxu0 %v2601_v1  ;;  %v18_v9 = vld [vmem:[%s3390_s3] sm:$0xff] }
   0x4   :  { %2466 = vmatpush3.bf16.msra.mxu1 %v2816_v3  ;;  %2441 = vmatprep.mubr.msk.bf16.mxu0 %vm115_vm0, %v2603_v5  ;;  %v312_v8 = vsub.s32 1, %v2818_v4  ;;  %v47_v11 = vsub.s32 0, %v2818_v4  ;;  %v2606_v5 = vld [vmem:[%s3389_s0 + $0x10] sm:$0xff]  }
   0x5   :  { %2513 = vmatprep.subr.bf16.mxu0 %v2816_v3  ;;  %2467 = vmatprep.subr.bf16.mxu1 %v2833_v7 }
   0x6   :  { %2442 = vmatmul.mubr.msk.bf16.vlgmr.msra.gmra.mrb[0].mxu0 %vm115_vm0, %v2604_v6  ;;  %v313_v10 = vrot.slane %v18_v9, %v312_v8  ;;  %v2854_v12 = vrot.slane %v18_v9, %v47_v11  ;;  %v2607_v6 = vld [vmem:[%s3389_s0 + $0x18] sm:$0xff]  }
   0x7   :  { %2514 = vmatpush3.bf16.msra.mxu0 %v2816_v3  ;;  %2445 = vmatprep.mubr.msk.bf16.mxu0 %vm115_vm0, %v2606_v5 }
   0x8   :  { %2468 = vmatpush3.bf16.msra.mxu1 %v2833_v7  ;;  %409 = vrot.lane.b32.xlu0 %v313_v10, %s2778_s27 }
   0x9   :  { %2473 = vmatprep.subr.bf16.mxu1 %v2816_v3  ;;  %2515 = vmatprep.subr.bf16.mxu0 %v2833_v7 }
   0xb   :  { %2470 = vmatmul.mubr.bf16.vlgmr.msra.gmra.mrb[0].mxu1 %v2777_v2  ;;  %2516 = vmatpush3.bf16.msra.mxu0 %v2833_v7 }
   0xc   :  { %2474 = vmatpush3.bf16.msra.mxu1 %v2816_v3 }
   0xd   :  { %2475 = vmatprep.subr.bf16.mxu1 %v2833_v7 }
   0xe   :  { %2446 = vmatmul.mubr.msk.bf16.gmra.mrb[4].mxu0 %vm115_vm0, %v2607_v6 }
  0x10   :  { %2476 = vmatpush3.bf16.msra.mxu1 %v2833_v7 }
  0x11   :  { %2481 = vmatprep.subr.bf16.mxu1 %v2816_v3 }
  0x7a   :  { %v2862_v21 = vpop.permute.xlu0 %409 }
  0xd9   :  { %v2443_v13 = vpop.f32.mrb[0].mxu0 }
  0xda   :  { %v195_v14 = vadd.f32 %v2443_v13, %v2854_v12  ;;  %v186_v15 = vpop.f32.mrb[1].mxu0 }
  0xdb   :  { %v187_v16 = vadd.f32 %v186_v15, %v2854_v12  ;;  %v2444_v17 = vpop.f32.mrb[2].mxu0 }
  0xdc   :  { %284 = vst.msk [vmem:[#allocation2 + $0x10] sm:$0xff] %vm281_vm1, %v195_v14  ;;  %v198_v18 = vadd.f32 %v2444_v17, %v2854_v12  ;;  %v189_v19 = vpop.f32.mrb[3].mxu0 }
  0xdd   :  { %282 = vst.msk [vmem:[#allocation2] sm:$0xff] %vm281_vm1, %v187_v16  ;;  %v190_v20 = vadd.f32 %v189_v19, %v2854_v12 }
  0xde   :  { %285 = vst.msk [vmem:[#allocation2 + $0x18] sm:$0xff] %vm281_vm1, %v198_v18  ;;  %v2471_v22 = vpop.f32.mrb[0].mxu1 }
  0xdf   :  { %283 = vst.msk [vmem:[#allocation2 + $0x8] sm:$0xff] %vm281_vm1, %v190_v20  ;;  %v373_v23 = vpop.f32.mrb[1].mxu1  ;;  %v414_v28 = vadd.f32 %v2471_v22, %v2862_v21 }
  0xe0   :  { %v412_v24 = vadd.f32 %v2862_v21, %v373_v23  ;;  %v2472_v25 = vpop.f32.mrb[2].mxu1 }
  0xe1   :  { %v376_v26 = vpop.f32.mrb[3].mxu1 }
  0xe2   :  { %418 = vrot.lane.b32.xlu0 %v412_v24, %s2778_s27  ;;  %v413_v27 = vadd.f32 %v2862_v21, %v376_v26 }
  0xe3   :  { %v322_v33 = vld [vmem:[#allocation2 + $0x10] sm:$0xff] }
  0xe4   :  { %420 = vrot.lane.b32.xlu1 %v413_v27, %s2778_s27  ;;  %v320_v29 = vld [vmem:[#allocation2] sm:$0xff]  ;;  %v389_v35 = vadd.f32 %v2471_v22, %v322_v33 }
  0xe5   :  { %v387_v31 = vadd.f32 %v373_v23, %v320_v29  ;;  %v2447_v23 = vpop.f32.mrb[4].mxu0 }
  0xe6   :  { %v321_v30 = vld [vmem:[#allocation2 + $0x8] sm:$0xff]  ;;  %v2312_v37 = vmul.f32 -1.442695, %v389_v35  ;;  %v211_v24 = vadd.f32 %v2447_v23, %v2854_v12  ;;  %v202_v25 = vpop.f32.mrb[5].mxu0 }
  0xe7   :  { %v388_v32 = vadd.f32 %v376_v26, %v321_v30  ;;  %v2310_v34 = vmul.f32 -1.442695, %v387_v31  ;;  %v203_v26 = vadd.f32 %v202_v25, %v2854_v12  ;;  %v2448_v27 = vpop.f32.mrb[6].mxu0 }
  0xe8   :  { %422 = vrot.lane.b32.xlu1 %v414_v28, %s2778_s27  ;;  %288 = vst.msk [vmem:[#allocation2 + $0x30] sm:$0xff] %vm281_vm1, %v211_v24  ;;  %v214_v28 = vadd.f32 %v2448_v27, %v2854_v12 }
  0xe9   :  { %v2311_v36 = vmul.f32 -1.442695, %v388_v32  ;;  %2630 = vpow2.f32 %v2310_v34  ;;  %286 = vst.msk [vmem:[#allocation2 + $0x20] sm:$0xff] %vm281_vm1, %v203_v26 }
  0xea   :  { %289 = vst.msk [vmem:[#allocation2 + $0x38] sm:$0xff] %vm281_vm1, %v214_v28 }
  0xeb   :  { %2632 = vpow2.f32 %v2311_v36 }
  0xec   :  { %2634 = vpow2.f32 %v2312_v37 }
  0xf3   :  { %v2631_v38 = vpop.eup %2630 }
  0xf4   :  { %v399_v40 = vadd.f32 1.0, %v2631_v38 }
  0xf5   :  { %v2633_v39 = vpop.eup %2632 }
  0xf6   :  { %v400_v41 = vadd.f32 1.0, %v2633_v39  ;;  %v2635_v42 = vpop.eup %2634  ;;  %2636 = vrcp.f32 %v399_v40  ;;  %v502_v40 = vld [vmem:[#allocation2 + $0x18] sm:$0xff] }
  0xf7   :  { %v401_v43 = vadd.f32 1.0, %v2635_v42 }
  0xf8   :  { %2638 = vrcp.f32 %v400_v41  ;;  %v503_v41 = vld [vmem:[#allocation2 + $0x20] sm:$0xff] }
  0xf9   :  { %2640 = vrcp.f32 %v401_v43 }
 0x100   :  { %v2637_v44 = vpop.eup %2636 }
 0x102   :  { %v2639_v47 = vpop.eup %2638 }
 0x103   :  { %v2641_v50 = vpop.eup %2640 }
 0x154   :  { %v419_v45 = vpop.permute.xlu0 %418 }
 0x155   :  { %v427_v46 = vmul.f32 %v2637_v44, %v419_v45 }
 0x156   :  { %v421_v48 = vpop.permute.xlu1 %420 }
 0x157   :  { %v428_v49 = vmul.f32 %v2639_v47, %v421_v48  ;;  %433 = vrot.lane.b32.xlu0 %v427_v46, %s2778_s27 }
 0x159   :  { %435 = vrot.lane.b32.xlu1 %v428_v49, %s2778_s27 }
 0x15a   :  { %v423_v51 = vpop.permute.xlu1 %422 }
 0x15b   :  { %v429_v52 = vmul.f32 %v2641_v50, %v423_v51 }
 0x15d   :  { %437 = vrot.lane.b32.xlu0 %v429_v52, %s2778_s27 }
 0x1c9   :  { %v434_v53 = vpop.permute.xlu0 %433 }
 0x1ca   :  { %v442_v54 = vadd.f32 %v434_v53, %v320_v29  ;;  %v205_v29 = vpop.f32.mrb[7].mxu0 }
 0x1cb   :  { %v436_v55 = vpop.permute.xlu1 %435 }
 0x1cc   :  { %2642 = vtanh.f32 %v442_v54  ;;  %v443_v56 = vadd.f32 %v436_v55, %v321_v30  ;;  %v206_v30 = vadd.f32 %v205_v29, %v2854_v12 }
 0x1ce   :  { %2644 = vtanh.f32 %v443_v56  ;;  %287 = vst.msk [vmem:[#allocation2 + $0x28] sm:$0xff] %vm281_vm1, %v206_v30 }
 0x1cf   :  { %v438_v57 = vpop.permute.xlu0 %437 }
 0x1d0   :  { %v444_v58 = vadd.f32 %v438_v57, %v322_v33 }
 0x1d2   :  { %2646 = vtanh.f32 %v444_v58 }
 0x1d5   :  { %v504_v43 = vld [vmem:[#allocation2 + $0x28] sm:$0xff] }
 0x1d6   :  { %v2643_v59 = vpop.eup %2642 }
 0x1d7   :  { %v448_v60 = vsub.f32 0.0, %v2643_v59 }
 0x1d8   :  { %v2645_v61 = vpop.eup %2644 }
 0x1d9   :  { %454 = vrot.lane.b32.xlu1 %v448_v60, %s2779_s28  ;;  %v449_v62 = vsub.f32 0.0, %v2645_v61 }
 0x1db   :  { %456 = vrot.lane.b32.xlu0 %v449_v62, %s2779_s28 }
 0x1dc   :  { %v2647_v63 = vpop.eup %2646 }
 0x1dd   :  { %v450_v0 = vsub.f32 0.0, %v2647_v63 }
 0x1df   :  { %458 = vrot.lane.b32.xlu1 %v450_v0, %s2779_s28 }
 0x24b   :  { %v455_v1 = vpop.permute.xlu1 %454 }
 0x24c   :  { %v463_v8 = vmul.f32 %v2637_v44, %v455_v1 }
 0x24d   :  { %v457_v9 = vpop.permute.xlu0 %456 }
 0x24e   :  { %v464_v10 = vmul.f32 %v2639_v47, %v457_v9  ;;  %469 = vrot.lane.b32.xlu0 %v463_v8, %s2780_s7 }
 0x250   :  { %471 = vrot.lane.b32.xlu1 %v464_v10, %s2780_s7 }
 0x251   :  { %v459_v11 = vpop.permute.xlu1 %458 }
 0x252   :  { %v465_v13 = vmul.f32 %v2641_v50, %v459_v11 }
 0x254   :  { %473 = vrot.lane.b32.xlu0 %v465_v13, %s2780_s7 }
 0x2c0   :  { %v470_v14 = vpop.permute.xlu0 %469 }
 0x2c1   :  { %v2889_v16 = vadd.f32 %v2643_v59, %v470_v14 }
 0x2c2   :  { %v472_v15 = vpop.permute.xlu1 %471 }
 0x2c3   :  { %v2891_v17 = vadd.f32 %v2645_v61, %v472_v15 }
 0x2c5   :  { %v505_v18 = vpack.c.bf16 %v2891_v17, %v2889_v16 }
 0x2c6   :  { %v474_v19 = vpop.permute.xlu0 %473 }
 0x2c7   :  { %v2895_v20 = vadd.f32 %v2647_v63, %v474_v19  ;;  %509 = vrot.lane.b32.xlu1 %v505_v18, %s2778_s27  ;;  %v2608_v19 = vld [vmem:[%s3389_s0 + $0x20] sm:$0xff]  }
 0x2c8   :  { %2449 = vmatprep.mubr.msk.bf16.mxu0 %vm115_vm0, %v2608_v19 }
 0x2c9   :  { %v506_v22 = vpack.c.bf16 %v2895_v20, %v2895_v20 }
 0x2cb   :  { %511 = vrot.lane.b32.xlu0 %v506_v22, %s2778_s27  ;;  %v2609_v22 = vld [vmem:[%s3389_s0 + $0x28] sm:$0xff]  }
 0x2cc   :  { %2450 = vmatmul.mubr.msk.bf16.gmra.mrb[8].mxu0 %vm115_vm0, %v2609_v22 }
 0x339   :  { %v510_v31 = vpop.permute.xlu1 %509 }
 0x33a   :  { %2477 = vmatprep.mubr.msk.bf16.mxu1 %vm335_vm2, %v510_v31 }
 0x33d   :  { %v512_v32 = vpop.permute.xlu0 %511 }
 0x33e   :  { %2478 = vmatmul.mubr.msk.bf16.vlgmr.msra.gmra.mrb[4].mxu1 %vm335_vm2, %v512_v32 }
 0x33f   :  { %2482 = vmatpush3.bf16.msra.mxu1 %v2816_v3 }
 0x340   :  { %2483 = vmatprep.subr.bf16.mxu1 %v2833_v7 }
 0x343   :  { %2484 = vmatpush3.bf16.msra.mxu1 %v2833_v7 }
 0x344   :  { %2489 = vmatprep.subr.bf16.mxu1 %v2816_v3 }
 0x411   :  { %v2479_v33 = vpop.f32.mrb[4].mxu1 }
 0x412   :  { %v553_v34 = vpop.f32.mrb[5].mxu1  ;;  %v590_v39 = vadd.f32 %v2479_v33, %v2862_v21  ;;  %v569_v45 = vadd.f32 %v2479_v33, %v504_v43 }
 0x413   :  { %v588_v35 = vadd.f32 %v553_v34, %v2862_v21  ;;  %v2480_v36 = vpop.f32.mrb[6].mxu1  ;;  %v567_v42 = vadd.f32 %v553_v34, %v502_v40 }
 0x414   :  { %v556_v37 = vpop.f32.mrb[7].mxu1  ;;  %v2317_v48 = vmul.f32 -1.442695, %v569_v45 }
 0x415   :  { %v589_v38 = vadd.f32 %v556_v37, %v2862_v21  ;;  %594 = vrot.lane.b32.xlu1 %v588_v35, %s2778_s27  ;;  %v568_v44 = vadd.f32 %v556_v37, %v503_v41  ;;  %v2315_v46 = vmul.f32 -1.442695, %v567_v42  ;;  %v2451_v37 = vpop.f32.mrb[8].mxu0 }
 0x417   :  { %596 = vrot.lane.b32.xlu0 %v589_v38, %s2778_s27  ;;  %v2316_v47 = vmul.f32 -1.442695, %v568_v44  ;;  %2648 = vpow2.f32 %v2315_v46  ;;  %v227_v38 = vadd.f32 %v2451_v37, %v2854_v12 }
 0x419   :  { %598 = vrot.lane.b32.xlu1 %v590_v39, %s2778_s27  ;;  %2650 = vpow2.f32 %v2316_v47  ;;  %v218_v39 = vpop.f32.mrb[9].mxu0  ;;  %292 = vst.msk [vmem:[#allocation2 + $0x50] sm:$0xff] %vm281_vm1, %v227_v38 }
 0x41a   :  { %2652 = vpow2.f32 %v2317_v48 }
 0x421   :  { %v2649_v49 = vpop.eup %2648 }
 0x422   :  { %v579_v51 = vadd.f32 1.0, %v2649_v49 }
 0x423   :  { %v2651_v50 = vpop.eup %2650 }
 0x424   :  { %v2653_v52 = vpop.eup %2652  ;;  %v580_v53 = vadd.f32 1.0, %v2651_v50  ;;  %2654 = vrcp.f32 %v579_v51 }
 0x425   :  { %v581_v54 = vadd.f32 1.0, %v2653_v52 }
 0x426   :  { %2656 = vrcp.f32 %v580_v53 }
 0x427   :  { %2658 = vrcp.f32 %v581_v54  ;;  %v678_v54 = vld [vmem:[#allocation2 + $0x30] sm:$0xff] }
 0x42e   :  { %v2655_v55 = vpop.eup %2654 }
 0x430   :  { %v2657_v58 = vpop.eup %2656 }
 0x431   :  { %v2659_v61 = vpop.eup %2658 }
 0x487   :  { %v595_v56 = vpop.permute.xlu1 %594 }
 0x488   :  { %v603_v57 = vmul.f32 %v2655_v55, %v595_v56 }
 0x489   :  { %v597_v59 = vpop.permute.xlu0 %596 }
 0x48a   :  { %v604_v60 = vmul.f32 %v2657_v58, %v597_v59  ;;  %609 = vrot.lane.b32.xlu0 %v603_v57, %s2778_s27  ;;  %v679_v57 = vld [vmem:[#allocation2 + $0x38] sm:$0xff] }
 0x48b   :  { %v599_v62 = vpop.permute.xlu1 %598 }
 0x48c   :  { %v605_v63 = vmul.f32 %v2659_v61, %v599_v62  ;;  %611 = vrot.lane.b32.xlu1 %v604_v60, %s2778_s27 }
 0x48e   :  { %613 = vrot.lane.b32.xlu0 %v605_v63, %s2778_s27 }
 0x4fc   :  { %v610_v0 = vpop.permute.xlu0 %609 }
 0x4fd   :  { %v618_v1 = vadd.f32 %v610_v0, %v502_v40  ;;  %v219_v40 = vadd.f32 %v218_v39, %v2854_v12 }
 0x4fe   :  { %v612_v5 = vpop.permute.xlu1 %611 }
 0x4ff   :  { %2660 = vtanh.f32 %v618_v1  ;;  %v619_v6 = vadd.f32 %v612_v5, %v503_v41  ;;  %290 = vst.msk [vmem:[#allocation2 + $0x40] sm:$0xff] %vm281_vm1, %v219_v40 }
 0x500   :  { %v614_v8 = vpop.permute.xlu0 %613 }
 0x501   :  { %2662 = vtanh.f32 %v619_v6  ;;  %v620_v9 = vadd.f32 %v614_v8, %v504_v43  ;;  %v2452_v43 = vpop.f32.mrb[10].mxu0 }
 0x502   :  { %v230_v44 = vadd.f32 %v2452_v43, %v2854_v12  ;;  %v221_v45 = vpop.f32.mrb[11].mxu0 }
 0x503   :  { %2664 = vtanh.f32 %v620_v9  ;;  %v222_v46 = vadd.f32 %v221_v45, %v2854_v12 }
 0x504   :  { %293 = vst.msk [vmem:[#allocation2 + $0x58] sm:$0xff] %vm281_vm1, %v230_v44 }
 0x505   :  { %291 = vst.msk [vmem:[#allocation2 + $0x48] sm:$0xff] %vm281_vm1, %v222_v46 }
 0x506   :  { %v680_v56 = vld [vmem:[#allocation2 + $0x40] sm:$0xff] }
 0x509   :  { %v2661_v10 = vpop.eup %2660 }
 0x50a   :  { %v624_v11 = vsub.f32 %v2889_v16, %v2661_v10 }
 0x50b   :  { %v2663_v13 = vpop.eup %2662 }
 0x50c   :  { %630 = vrot.lane.b32.xlu1 %v624_v11, %s2779_s28  ;;  %v625_v14 = vsub.f32 %v2891_v17, %v2663_v13 }
 0x50d   :  { %v2665_v15 = vpop.eup %2664 }
 0x50e   :  { %632 = vrot.lane.b32.xlu0 %v625_v14, %s2779_s28  ;;  %v626_v18 = vsub.f32 %v2895_v20, %v2665_v15 }
 0x510   :  { %634 = vrot.lane.b32.xlu1 %v626_v18, %s2779_s28 }
 0x57e   :  { %v631_v23 = vpop.permute.xlu1 %630 }
 0x57f   :  { %v639_v24 = vmul.f32 %v2655_v55, %v631_v23 }
 0x580   :  { %v633_v25 = vpop.permute.xlu0 %632 }
 0x581   :  { %v640_v26 = vmul.f32 %v2657_v58, %v633_v25  ;;  %645 = vrot.lane.b32.xlu0 %v639_v24, %s2780_s7 }
 0x582   :  { %v635_v27 = vpop.permute.xlu1 %634 }
 0x583   :  { %v641_v28 = vmul.f32 %v2659_v61, %v635_v27  ;;  %647 = vrot.lane.b32.xlu1 %v640_v26, %s2780_s7 }
 0x585   :  { %649 = vrot.lane.b32.xlu0 %v641_v28, %s2780_s7 }
 0x5f3   :  { %v646_v29 = vpop.permute.xlu0 %645 }
 0x5f4   :  { %v2941_v31 = vadd.f32 %v2661_v10, %v646_v29 }
 0x5f5   :  { %v648_v30 = vpop.permute.xlu1 %647 }
 0x5f6   :  { %v2943_v32 = vadd.f32 %v2663_v13, %v648_v30 }
 0x5f7   :  { %v650_v33 = vpop.permute.xlu0 %649 }
 0x5f8   :  { %v2945_v34 = vadd.f32 %v2665_v15, %v650_v33  ;;  %v681_v35 = vpack.c.bf16 %v2943_v32, %v2941_v31 }
 0x5fa   :  { %685 = vrot.lane.b32.xlu1 %v681_v35, %s2778_s27  ;;  %v682_v36 = vpack.c.bf16 %v2945_v34, %v2945_v34 }
 0x5fc   :  { %687 = vrot.lane.b32.xlu0 %v682_v36, %s2778_s27 }
 0x66c   :  { %v686_v41 = vpop.permute.xlu1 %685 }
 0x66d   :  { %2485 = vmatprep.mubr.msk.bf16.mxu1 %vm335_vm2, %v686_v41 }
 0x66e   :  { %v688_v42 = vpop.permute.xlu0 %687 }
 0x66f   :  { %2486 = vmatmul.mubr.msk.bf16.vlgmr.msra.gmra.mrb[8].mxu1 %vm335_vm2, %v688_v42 }
 0x670   :  { %2490 = vmatpush3.bf16.msra.mxu1 %v2816_v3 }
 0x671   :  { %2491 = vmatprep.subr.bf16.mxu1 %v2833_v7 }
 0x674   :  { %2492 = vmatpush3.bf16.msra.mxu1 %v2833_v7 }
 0x675   :  { %2497 = vmatprep.subr.bf16.mxu1 %v2816_v3 }
 0x742   :  { %v2487_v47 = vpop.f32.mrb[8].mxu1 }
 0x743   :  { %v729_v48 = vpop.f32.mrb[9].mxu1  ;;  %v766_v53 = vadd.f32 %v2487_v47, %v2862_v21  ;;  %v745_v59 = vadd.f32 %v2487_v47, %v680_v56 }
 0x744   :  { %v764_v49 = vadd.f32 %v729_v48, %v2862_v21  ;;  %v2488_v50 = vpop.f32.mrb[10].mxu1  ;;  %v743_v55 = vadd.f32 %v729_v48, %v678_v54 }
 0x745   :  { %v732_v51 = vpop.f32.mrb[11].mxu1  ;;  %v2322_v62 = vmul.f32 -1.442695, %v745_v59 }
 0x746   :  { %v765_v52 = vadd.f32 %v732_v51, %v2862_v21  ;;  %770 = vrot.lane.b32.xlu1 %v764_v49, %s2778_s27  ;;  %v744_v58 = vadd.f32 %v732_v51, %v679_v57  ;;  %v2320_v60 = vmul.f32 -1.442695, %v743_v55 }
 0x748   :  { %772 = vrot.lane.b32.xlu0 %v765_v52, %s2778_s27  ;;  %v2321_v61 = vmul.f32 -1.442695, %v744_v58  ;;  %2666 = vpow2.f32 %v2320_v60 }
 0x74a   :  { %774 = vrot.lane.b32.xlu1 %v766_v53, %s2778_s27  ;;  %2668 = vpow2.f32 %v2321_v61  ;;  %v854_v61 = vld [vmem:[#allocation2 + $0x48] sm:$0xff] }
 0x74b   :  { %2670 = vpow2.f32 %v2322_v62 }
 0x752   :  { %v2667_v63 = vpop.eup %2666 }
 0x753   :  { %v755_v1 = vadd.f32 1.0, %v2667_v63  ;;  %v855_v63 = vld [vmem:[#allocation2 + $0x50] sm:$0xff] }
 0x754   :  { %v2669_v0 = vpop.eup %2668 }
 0x755   :  { %v2671_v5 = vpop.eup %2670  ;;  %v756_v6 = vadd.f32 1.0, %v2669_v0  ;;  %2672 = vrcp.f32 %v755_v1  ;;  %v856_v1 = vld [vmem:[#allocation2 + $0x58] sm:$0xff] }
 0x756   :  { %v757_v8 = vadd.f32 1.0, %v2671_v5 }
 0x757   :  { %2674 = vrcp.f32 %v756_v6 }
 0x758   :  { %2676 = vrcp.f32 %v757_v8 }
 0x75f   :  { %v2673_v9 = vpop.eup %2672 }
 0x761   :  { %v2675_v13 = vpop.eup %2674 }
 0x762   :  { %v2677_v18 = vpop.eup %2676 }
 0x7b8   :  { %v771_v10 = vpop.permute.xlu1 %770 }
 0x7b9   :  { %v779_v11 = vmul.f32 %v2673_v9, %v771_v10 }
 0x7ba   :  { %v773_v14 = vpop.permute.xlu0 %772 }
 0x7bb   :  { %v780_v15 = vmul.f32 %v2675_v13, %v773_v14  ;;  %785 = vrot.lane.b32.xlu0 %v779_v11, %s2778_s27 }
 0x7bc   :  { %v775_v19 = vpop.permute.xlu1 %774 }
 0x7bd   :  { %v781_v22 = vmul.f32 %v2677_v18, %v775_v19  ;;  %787 = vrot.lane.b32.xlu1 %v780_v15, %s2778_s27 }
 0x7bf   :  { %789 = vrot.lane.b32.xlu0 %v781_v22, %s2778_s27 }
 0x82d   :  { %v786_v23 = vpop.permute.xlu0 %785 }
 0x82e   :  { %v794_v24 = vadd.f32 %v786_v23, %v678_v54 }
 0x82f   :  { %v788_v25 = vpop.permute.xlu1 %787 }
 0x830   :  { %2678 = vtanh.f32 %v794_v24  ;;  %v795_v26 = vadd.f32 %v788_v25, %v679_v57 }
 0x831   :  { %v790_v27 = vpop.permute.xlu0 %789 }
 0x832   :  { %2680 = vtanh.f32 %v795_v26  ;;  %v796_v28 = vadd.f32 %v790_v27, %v680_v56 }
 0x834   :  { %2682 = vtanh.f32 %v796_v28 }
 0x83a   :  { %v2679_v29 = vpop.eup %2678 }
 0x83b   :  { %v800_v30 = vsub.f32 %v2941_v31, %v2679_v29 }
 0x83c   :  { %v2681_v33 = vpop.eup %2680 }
 0x83d   :  { %806 = vrot.lane.b32.xlu1 %v800_v30, %s2779_s28  ;;  %v801_v35 = vsub.f32 %v2943_v32, %v2681_v33 }
 0x83e   :  { %v2683_v36 = vpop.eup %2682 }
 0x83f   :  { %808 = vrot.lane.b32.xlu0 %v801_v35, %s2779_s28  ;;  %v802_v37 = vsub.f32 %v2945_v34, %v2683_v36 }
 0x841   :  { %810 = vrot.lane.b32.xlu1 %v802_v37, %s2779_s28 }
 0x8af   :  { %v807_v38 = vpop.permute.xlu1 %806 }
 0x8b0   :  { %v815_v39 = vmul.f32 %v2673_v9, %v807_v38 }
 0x8b1   :  { %v809_v40 = vpop.permute.xlu0 %808 }
 0x8b2   :  { %v816_v41 = vmul.f32 %v2675_v13, %v809_v40  ;;  %821 = vrot.lane.b32.xlu0 %v815_v39, %s2780_s7 }
 0x8b3   :  { %v811_v42 = vpop.permute.xlu1 %810 }
 0x8b4   :  { %v817_v43 = vmul.f32 %v2677_v18, %v811_v42  ;;  %823 = vrot.lane.b32.xlu1 %v816_v41, %s2780_s7 }
 0x8b6   :  { %825 = vrot.lane.b32.xlu0 %v817_v43, %s2780_s7 }
 0x924   :  { %v822_v44 = vpop.permute.xlu0 %821 }
 0x925   :  { %v2985_v46 = vadd.f32 %v2679_v29, %v822_v44 }
 0x926   :  { %v824_v45 = vpop.permute.xlu1 %823 }
 0x927   :  { %v2987_v47 = vadd.f32 %v2681_v33, %v824_v45  ;;  %v2610_v45 = vld [vmem:[%s3389_s0 + $0x30] sm:$0xff]  }
 0x928   :  { %v826_v48 = vpop.permute.xlu0 %825  ;;  %2453 = vmatprep.mubr.msk.bf16.mxu0 %vm115_vm0, %v2610_v45 }
 0x929   :  { %v2989_v49 = vadd.f32 %v2683_v36, %v826_v48  ;;  %v857_v50 = vpack.c.bf16 %v2987_v47, %v2985_v46  ;;  %v2611_v48 = vld [vmem:[%s3389_s0 + $0x38] sm:$0xff]  }
 0x92a   :  { %2454 = vmatmul.mubr.msk.bf16.gmra.mrb[12].mxu0 %vm115_vm0, %v2611_v48 }
 0x92b   :  { %861 = vrot.lane.b32.xlu1 %v857_v50, %s2778_s27  ;;  %v858_v51 = vpack.c.bf16 %v2989_v49, %v2989_v49 }
 0x92d   :  { %863 = vrot.lane.b32.xlu0 %v858_v51, %s2778_s27 }
 0x99d   :  { %v862_v52 = vpop.permute.xlu1 %861 }
 0x99e   :  { %2493 = vmatprep.mubr.msk.bf16.mxu1 %vm335_vm2, %v862_v52 }
 0x99f   :  { %v864_v53 = vpop.permute.xlu0 %863 }
 0x9a0   :  { %2494 = vmatmul.mubr.msk.bf16.vlgmr.msra.gmra.mrb[12].mxu1 %vm335_vm2, %v864_v53 }
 0x9a1   :  { %2498 = vmatpush3.bf16.msra.mxu1 %v2816_v3 }
 0x9a2   :  { %2499 = vmatprep.subr.bf16.mxu1 %v2833_v7 }
 0x9a5   :  { %2500 = vmatpush3.bf16.msra.mxu1 %v2833_v7 }
 0x9a6   :  { %2505 = vmatprep.subr.bf16.mxu1 %v2816_v3 }
 0xa73   :  { %v2495_v54 = vpop.f32.mrb[12].mxu1 }
 0xa74   :  { %v905_v55 = vpop.f32.mrb[13].mxu1  ;;  %v942_v60 = vadd.f32 %v2495_v54, %v2862_v21  ;;  %v921_v5 = vadd.f32 %v2495_v54, %v856_v1 }
 0xa75   :  { %v940_v56 = vadd.f32 %v905_v55, %v2862_v21  ;;  %v2496_v57 = vpop.f32.mrb[14].mxu1  ;;  %v919_v62 = vadd.f32 %v905_v55, %v854_v61 }
 0xa76   :  { %v908_v58 = vpop.f32.mrb[15].mxu1  ;;  %v2327_v9 = vmul.f32 -1.442695, %v921_v5 }
 0xa77   :  { %v941_v59 = vadd.f32 %v908_v58, %v2862_v21  ;;  %946 = vrot.lane.b32.xlu1 %v940_v56, %s2778_s27  ;;  %v920_v0 = vadd.f32 %v908_v58, %v855_v63  ;;  %v2325_v6 = vmul.f32 -1.442695, %v919_v62 }
 0xa79   :  { %948 = vrot.lane.b32.xlu0 %v941_v59, %s2778_s27  ;;  %v2326_v8 = vmul.f32 -1.442695, %v920_v0  ;;  %2684 = vpow2.f32 %v2325_v6  ;;  %v2455_v0 = vpop.f32.mrb[12].mxu0 }
 0xa7a   :  { %v234_v5 = vpop.f32.mrb[13].mxu0 }
 0xa7b   :  { %950 = vrot.lane.b32.xlu1 %v942_v60, %s2778_s27  ;;  %2686 = vpow2.f32 %v2326_v8  ;;  %v235_v6 = vadd.f32 %v234_v5, %v2854_v12  ;;  %v2456_v8 = vpop.f32.mrb[14].mxu0 }
 0xa7c   :  { %2688 = vpow2.f32 %v2327_v9  ;;  %v246_v9 = vadd.f32 %v2456_v8, %v2854_v12 }
 0xa7d   :  { %294 = vst.msk [vmem:[#allocation2 + $0x60] sm:$0xff] %vm281_vm1, %v235_v6 }
 0xa7e   :  { %297 = vst.msk [vmem:[#allocation2 + $0x78] sm:$0xff] %vm281_vm1, %v246_v9  ;;  %v2612_v9 = vld [vmem:[%s3389_s0 + $0x40] sm:$0xff]  }
 0xa7f   :  { %2457 = vmatprep.mubr.msk.bf16.mxu0 %vm115_vm0, %v2612_v9 }
 0xa83   :  { %v2685_v10 = vpop.eup %2684 }
 0xa84   :  { %v931_v13 = vadd.f32 1.0, %v2685_v10  ;;  %v237_v10 = vpop.f32.mrb[15].mxu0 }
 0xa85   :  { %v2687_v11 = vpop.eup %2686 }
 0xa86   :  { %v2689_v14 = vpop.eup %2688  ;;  %v932_v15 = vadd.f32 1.0, %v2687_v11  ;;  %2690 = vrcp.f32 %v931_v13  ;;  %v238_v11 = vadd.f32 %v237_v10, %v2854_v12  ;;  %v2613_v10 = vld [vmem:[%s3389_s0 + $0x48] sm:$0xff]  }
 0xa87   :  { %v933_v18 = vadd.f32 1.0, %v2689_v14  ;;  %2458 = vmatmul.mubr.msk.bf16.gmra.mrb[16].mxu0 %vm115_vm0, %v2613_v10 }
 0xa88   :  { %2692 = vrcp.f32 %v932_v15  ;;  %295 = vst.msk [vmem:[#allocation2 + $0x68] sm:$0xff] %vm281_vm1, %v238_v11 }
 0xa89   :  { %2694 = vrcp.f32 %v933_v18 }
 0xa90   :  { %v2691_v19 = vpop.eup %2690 }
 0xa92   :  { %v2693_v24 = vpop.eup %2692 }
 0xa93   :  { %v2695_v27 = vpop.eup %2694 }
 0xae9   :  { %v947_v22 = vpop.permute.xlu1 %946 }
 0xaea   :  { %v955_v23 = vmul.f32 %v2691_v19, %v947_v22 }
 0xaeb   :  { %v949_v25 = vpop.permute.xlu0 %948 }
 0xaec   :  { %v956_v26 = vmul.f32 %v2693_v24, %v949_v25  ;;  %961 = vrot.lane.b32.xlu0 %v955_v23, %s2778_s27 }
 0xaed   :  { %v951_v28 = vpop.permute.xlu1 %950 }
 0xaee   :  { %v957_v29 = vmul.f32 %v2695_v27, %v951_v28  ;;  %963 = vrot.lane.b32.xlu1 %v956_v26, %s2778_s27  ;;  %v1030_v26 = vld [vmem:[#allocation2 + $0x60] sm:$0xff] }
 0xaf0   :  { %965 = vrot.lane.b32.xlu0 %v957_v29, %s2778_s27 }
 0xb5e   :  { %v962_v30 = vpop.permute.xlu0 %961 }
 0xb5f   :  { %v970_v33 = vadd.f32 %v962_v30, %v854_v61 }
 0xb60   :  { %v964_v35 = vpop.permute.xlu1 %963 }
 0xb61   :  { %2696 = vtanh.f32 %v970_v33  ;;  %v971_v36 = vadd.f32 %v964_v35, %v855_v63 }
 0xb62   :  { %v966_v37 = vpop.permute.xlu0 %965 }
 0xb63   :  { %2698 = vtanh.f32 %v971_v36  ;;  %v972_v38 = vadd.f32 %v966_v37, %v856_v1  ;;  %v243_v1 = vadd.f32 %v2455_v0, %v2854_v12 }
 0xb65   :  { %2700 = vtanh.f32 %v972_v38  ;;  %296 = vst.msk [vmem:[#allocation2 + $0x70] sm:$0xff] %vm281_vm1, %v243_v1 }
 0xb6b   :  { %v2697_v39 = vpop.eup %2696 }
 0xb6c   :  { %v976_v40 = vsub.f32 %v2985_v46, %v2697_v39 }
 0xb6d   :  { %v2699_v41 = vpop.eup %2698 }
 0xb6e   :  { %982 = vrot.lane.b32.xlu1 %v976_v40, %s2779_s28  ;;  %v977_v42 = vsub.f32 %v2987_v47, %v2699_v41 }
 0xb6f   :  { %v2701_v43 = vpop.eup %2700 }
 0xb70   :  { %984 = vrot.lane.b32.xlu0 %v977_v42, %s2779_s28  ;;  %v978_v44 = vsub.f32 %v2989_v49, %v2701_v43 }
 0xb72   :  { %986 = vrot.lane.b32.xlu1 %v978_v44, %s2779_s28 }
 0xbe0   :  { %v983_v50 = vpop.permute.xlu1 %982 }
 0xbe1   :  { %v991_v51 = vmul.f32 %v2691_v19, %v983_v50 }
 0xbe2   :  { %v985_v52 = vpop.permute.xlu0 %984 }
 0xbe3   :  { %v992_v53 = vmul.f32 %v2693_v24, %v985_v52  ;;  %997 = vrot.lane.b32.xlu0 %v991_v51, %s2780_s7 }
 0xbe4   :  { %v987_v54 = vpop.permute.xlu1 %986 }
 0xbe5   :  { %v993_v55 = vmul.f32 %v2695_v27, %v987_v54  ;;  %999 = vrot.lane.b32.xlu1 %v992_v53, %s2780_s7 }
 0xbe7   :  { %1001 = vrot.lane.b32.xlu0 %v993_v55, %s2780_s7 }
 0xc55   :  { %v998_v56 = vpop.permute.xlu0 %997 }
 0xc56   :  { %v3029_v58 = vadd.f32 %v2697_v39, %v998_v56 }
 0xc57   :  { %v1000_v57 = vpop.permute.xlu1 %999 }
 0xc58   :  { %v3031_v59 = vadd.f32 %v2699_v41, %v1000_v57 }
 0xc59   :  { %v1002_v60 = vpop.permute.xlu0 %1001 }
 0xc5a   :  { %v3033_v61 = vadd.f32 %v2701_v43, %v1002_v60  ;;  %v1033_v62 = vpack.c.bf16 %v3031_v59, %v3029_v58 }
 0xc5c   :  { %1037 = vrot.lane.b32.xlu1 %v1033_v62, %s2778_s27  ;;  %v1034_v63 = vpack.c.bf16 %v3033_v61, %v3033_v61 }
 0xc5e   :  { %1039 = vrot.lane.b32.xlu0 %v1034_v63, %s2778_s27 }
 0xcce   :  { %v1038_v13 = vpop.permute.xlu1 %1037 }
 0xccf   :  { %2501 = vmatprep.mubr.msk.bf16.mxu1 %vm335_vm2, %v1038_v13 }
 0xcd0   :  { %v1040_v14 = vpop.permute.xlu0 %1039 }
 0xcd1   :  { %2502 = vmatmul.mubr.msk.bf16.vlgmr.msra.gmra.mrb[16].mxu1 %vm335_vm2, %v1040_v14 }
 0xcd2   :  { %2506 = vmatpush3.bf16.msra.mxu1 %v2816_v3 }
 0xcd3   :  { %2507 = vmatprep.subr.bf16.mxu1 %v2833_v7 }
 0xcd6   :  { %2508 = vmatpush3.bf16.msra.mxu1 %v2833_v7  ;;  %v1031_v7 = vld [vmem:[#allocation2 + $0x68] sm:$0xff] }
 0xcd7   :  { %2521 = vmatprep.subr.bf16.mxu1 %v2816_v3  ;;  %v1032_v3 = vld [vmem:[#allocation2 + $0x70] sm:$0xff] }
 0xda4   :  { %v2503_v15 = vpop.f32.mrb[16].mxu1 }
 0xda5   :  { %v1081_v18 = vpop.f32.mrb[17].mxu1  ;;  %v1118_v25 = vadd.f32 %v2503_v15, %v2862_v21  ;;  %v1097_v29 = vadd.f32 %v2503_v15, %v1032_v3 }
 0xda6   :  { %v1116_v19 = vadd.f32 %v1081_v18, %v2862_v21  ;;  %v2504_v22 = vpop.f32.mrb[18].mxu1  ;;  %v1095_v27 = vadd.f32 %v1081_v18, %v1030_v26 }
 0xda7   :  { %v1084_v23 = vpop.f32.mrb[19].mxu1  ;;  %v2332_v35 = vmul.f32 -1.442695, %v1097_v29 }
 0xda8   :  { %v1117_v24 = vadd.f32 %v1084_v23, %v2862_v21  ;;  %1122 = vrot.lane.b32.xlu1 %v1116_v19, %s2778_s27  ;;  %v1096_v28 = vadd.f32 %v1084_v23, %v1031_v7  ;;  %v2330_v30 = vmul.f32 -1.442695, %v1095_v27 }
 0xdaa   :  { %1124 = vrot.lane.b32.xlu0 %v1117_v24, %s2778_s27  ;;  %v2331_v33 = vmul.f32 -1.442695, %v1096_v28  ;;  %2702 = vpow2.f32 %v2330_v30  ;;  %v2459_v28 = vpop.f32.mrb[16].mxu0 }
 0xdab   :  { %v259_v29 = vadd.f32 %v2459_v28, %v2854_v12  ;;  %v250_v30 = vpop.f32.mrb[17].mxu0 }
 0xdac   :  { %1126 = vrot.lane.b32.xlu1 %v1118_v25, %s2778_s27  ;;  %2704 = vpow2.f32 %v2331_v33  ;;  %v251_v33 = vadd.f32 %v250_v30, %v2854_v12 }
 0xdad   :  { %2706 = vpow2.f32 %v2332_v35  ;;  %v2460_v35 = vpop.f32.mrb[18].mxu0  ;;  %300 = vst.msk [vmem:[#allocation2 + $0x90] sm:$0xff] %vm281_vm1, %v259_v29 }
 0xdae   :  { %298 = vst.msk [vmem:[#allocation2 + $0x80] sm:$0xff] %vm281_vm1, %v251_v33 }
 0xdb4   :  { %v2703_v36 = vpop.eup %2702 }
 0xdb5   :  { %v1107_v38 = vadd.f32 1.0, %v2703_v36  ;;  %v262_v36 = vadd.f32 %v2460_v35, %v2854_v12 }
 0xdb6   :  { %v2705_v37 = vpop.eup %2704 }
 0xdb7   :  { %v2707_v39 = vpop.eup %2706  ;;  %v1108_v40 = vadd.f32 1.0, %v2705_v37  ;;  %2708 = vrcp.f32 %v1107_v38  ;;  %v253_v37 = vpop.f32.mrb[19].mxu0  ;;  %301 = vst.msk [vmem:[#allocation2 + $0x98] sm:$0xff] %vm281_vm1, %v262_v36 }
 0xdb8   :  { %v1109_v41 = vadd.f32 1.0, %v2707_v39  ;;  %v254_v38 = vadd.f32 %v253_v37, %v2854_v12 }
 0xdb9   :  { %2710 = vrcp.f32 %v1108_v40 }
 0xdba   :  { %2712 = vrcp.f32 %v1109_v41  ;;  %299 = vst.msk [vmem:[#allocation2 + $0x88] sm:$0xff] %vm281_vm1, %v254_v38  ;;  %v2774_v41 = vld [vmem:[%s3388_s2 + $0x8] sm:$0xff]  }
 0xdc1   :  { %v2709_v42 = vpop.eup %2708 }
 0xdc3   :  { %v2711_v45 = vpop.eup %2710 }
 0xdc4   :  { %v2713_v51 = vpop.eup %2712 }
 0xe1a   :  { %v1123_v43 = vpop.permute.xlu1 %1122 }
 0xe1b   :  { %v1131_v44 = vmul.f32 %v2709_v42, %v1123_v43 }
 0xe1c   :  { %v1125_v48 = vpop.permute.xlu0 %1124 }
 0xe1d   :  { %v1132_v50 = vmul.f32 %v2711_v45, %v1125_v48  ;;  %1137 = vrot.lane.b32.xlu0 %v1131_v44, %s2778_s27 }
 0xe1e   :  { %v1127_v52 = vpop.permute.xlu1 %1126 }
 0xe1f   :  { %v1133_v53 = vmul.f32 %v2713_v51, %v1127_v52  ;;  %1139 = vrot.lane.b32.xlu1 %v1132_v50, %s2778_s27 }
 0xe21   :  { %1141 = vrot.lane.b32.xlu0 %v1133_v53, %s2778_s27  ;;  %v1206_v53 = vld [vmem:[#allocation2 + $0x78] sm:$0xff] }
 0xe8f   :  { %v1138_v54 = vpop.permute.xlu0 %1137 }
 0xe90   :  { %v1146_v55 = vadd.f32 %v1138_v54, %v1030_v26  ;;  %v1207_v54 = vld [vmem:[#allocation2 + $0x80] sm:$0xff] }
 0xe91   :  { %v1140_v56 = vpop.permute.xlu1 %1139 }
 0xe92   :  { %2714 = vtanh.f32 %v1146_v55  ;;  %v1147_v57 = vadd.f32 %v1140_v56, %v1031_v7  ;;  %v1208_v56 = vld [vmem:[#allocation2 + $0x88] sm:$0xff] }
 0xe93   :  { %v1142_v60 = vpop.permute.xlu0 %1141 }
 0xe94   :  { %2716 = vtanh.f32 %v1147_v57  ;;  %v1148_v62 = vadd.f32 %v1142_v60, %v1032_v3 }
 0xe96   :  { %2718 = vtanh.f32 %v1148_v62 }
 0xe9c   :  { %v2715_v63 = vpop.eup %2714 }
 0xe9d   :  { %v1152_v0 = vsub.f32 %v3029_v58, %v2715_v63 }
 0xe9e   :  { %v2717_v1 = vpop.eup %2716 }
 0xe9f   :  { %1158 = vrot.lane.b32.xlu1 %v1152_v0, %s2779_s28  ;;  %v1153_v5 = vsub.f32 %v3031_v59, %v2717_v1 }
 0xea0   :  { %v2719_v6 = vpop.eup %2718 }
 0xea1   :  { %1160 = vrot.lane.b32.xlu0 %v1153_v5, %s2779_s28  ;;  %v1154_v8 = vsub.f32 %v3033_v61, %v2719_v6 }
 0xea3   :  { %1162 = vrot.lane.b32.xlu1 %v1154_v8, %s2779_s28 }
 0xf11   :  { %v1159_v11 = vpop.permute.xlu1 %1158 }
 0xf12   :  { %v1167_v13 = vmul.f32 %v2709_v42, %v1159_v11  ;;  %v2775_v42 = vld [vmem:[%s3388_s2 + $0x10] sm:$0xff]  }
 0xf13   :  { %v1161_v14 = vpop.permute.xlu0 %1160 }
 0xf14   :  { %v1168_v15 = vmul.f32 %v2711_v45, %v1161_v14  ;;  %1173 = vrot.lane.b32.xlu0 %v1167_v13, %s2780_s7 }
 0xf15   :  { %v1163_v18 = vpop.permute.xlu1 %1162 }
 0xf16   :  { %v1169_v19 = vmul.f32 %v2713_v51, %v1163_v18  ;;  %1175 = vrot.lane.b32.xlu1 %v1168_v15, %s2780_s7 }
 0xf18   :  { %1177 = vrot.lane.b32.xlu0 %v1169_v19, %s2780_s7 }
 0xf86   :  { %v1174_v22 = vpop.permute.xlu0 %1173 }
 0xf87   :  { %v3081_v24 = vadd.f32 %v2715_v63, %v1174_v22 }
 0xf88   :  { %v1176_v23 = vpop.permute.xlu1 %1175 }
 0xf89   :  { %v3083_v25 = vadd.f32 %v2717_v1, %v1176_v23 }
 0xf8a   :  { %v1178_v26 = vpop.permute.xlu0 %1177 }
 0xf8b   :  { %v3085_v7 = vadd.f32 %v2719_v6, %v1178_v26  ;;  %v1209_v27 = vpack.c.bf16 %v3083_v25, %v3081_v24 }
 0xf8d   :  { %1213 = vrot.lane.b32.xlu1 %v1209_v27, %s2778_s27  ;;  %v1210_v3 = vpack.c.bf16 %v3085_v7, %v3085_v7 }
 0xf8f   :  { %1215 = vrot.lane.b32.xlu0 %v1210_v3, %s2778_s27 }
 0xfff   :  { %v1214_v39 = vpop.permute.xlu1 %1213 }
0x1000   :  { %2509 = vmatprep.mubr.msk.bf16.mxu1 %vm335_vm2, %v1214_v39 }
0x1001   :  { %v1216_v40 = vpop.permute.xlu0 %1215 }
0x1002   :  { %2510 = vmatmul.mubr.msk.bf16.vlgmr.msra.gmra.mrb[20].mxu1 %vm335_vm2, %v1216_v40 }
0x1003   :  { %2522 = vmatpush3.bf16.msra.mxu1 %v2774_v41  ;;  %v2614_v41 = vld [vmem:[%s3389_s0 + $0x50] sm:$0xff]  }
0x1004   :  { %2523 = vmatprep.subr.bf16.mxu1 %v2775_v42  ;;  %2461 = vmatprep.mubr.msk.bf16.mxu0 %vm115_vm0, %v2614_v41 }
0x1007   :  { %2524 = vmatpush3.bf16.msra.mxu1 %v2775_v42  ;;  %v2615_v42 = vld [vmem:[%s3389_s0 + $0x58] sm:$0xff]  }
0x1008   :  { %2462 = vmatmul.mubr.msk.bf16.gmra.mrb[20].mxu0 %vm115_vm0, %v2615_v42 }
0x10d5   :  { %v2511_v43 = vpop.f32.mrb[20].mxu1 }
0x10d6   :  { %v1257_v44 = vpop.f32.mrb[21].mxu1  ;;  %v1294_v52 = vadd.f32 %v2511_v43, %v2862_v21  ;;  %v1273_v60 = vadd.f32 %v2511_v43, %v1208_v56 }
0x10d7   :  { %v1292_v45 = vadd.f32 %v1257_v44, %v2862_v21  ;;  %v2512_v48 = vpop.f32.mrb[22].mxu1  ;;  %v1271_v55 = vadd.f32 %v1257_v44, %v1206_v53 }
0x10d8   :  { %v1260_v50 = vpop.f32.mrb[23].mxu1  ;;  %v2337_v0 = vmul.f32 -1.442695, %v1273_v60 }
0x10d9   :  { %v1293_v51 = vadd.f32 %v1260_v50, %v2862_v21  ;;  %1298 = vrot.lane.b32.xlu1 %v1292_v45, %s2778_s27  ;;  %v1272_v57 = vadd.f32 %v1260_v50, %v1207_v54  ;;  %v2335_v62 = vmul.f32 -1.442695, %v1271_v55 }
0x10db   :  { %1300 = vrot.lane.b32.xlu0 %v1293_v51, %s2778_s27  ;;  %v2336_v63 = vmul.f32 -1.442695, %v1272_v57  ;;  %2720 = vpow2.f32 %v2335_v62 }
0x10dd   :  { %1302 = vrot.lane.b32.xlu1 %v1294_v52, %s2778_s27  ;;  %2722 = vpow2.f32 %v2336_v63  ;;  %v2463_v63 = vpop.f32.mrb[20].mxu0 }
0x10de   :  { %2724 = vpow2.f32 %v2337_v0  ;;  %v275_v0 = vadd.f32 %v2463_v63, %v2854_v12 }
0x10e0   :  { %304 = vst.msk [vmem:[#allocation2 + $0xb0] sm:$0xff] %vm281_vm1, %v275_v0 }
0x10e5   :  { %v2721_v1 = vpop.eup %2720 }
0x10e6   :  { %v1283_v6 = vadd.f32 1.0, %v2721_v1  ;;  %v266_v1 = vpop.f32.mrb[21].mxu0 }
0x10e7   :  { %v2723_v5 = vpop.eup %2722 }
0x10e8   :  { %v2725_v8 = vpop.eup %2724  ;;  %v1284_v9 = vadd.f32 1.0, %v2723_v5  ;;  %2726 = vrcp.f32 %v1283_v6  ;;  %v267_v5 = vadd.f32 %v266_v1, %v2854_v12  ;;  %v2464_v6 = vpop.f32.mrb[22].mxu0 }
0x10e9   :  { %v1285_v10 = vadd.f32 1.0, %v2725_v8  ;;  %v278_v8 = vadd.f32 %v2464_v6, %v2854_v12 }
0x10ea   :  { %2728 = vrcp.f32 %v1284_v9  ;;  %v269_v9 = vpop.f32.mrb[23].mxu0  ;;  %302 = vst.msk [vmem:[#allocation2 + $0xa0] sm:$0xff] %vm281_vm1, %v267_v5 }
0x10eb   :  { %2730 = vrcp.f32 %v1285_v10  ;;  %v270_v10 = vadd.f32 %v269_v9, %v2854_v12  ;;  %305 = vst.msk [vmem:[#allocation2 + $0xb8] sm:$0xff] %vm281_vm1, %v278_v8 }
0x10ed   :  { %303 = vst.msk [vmem:[#allocation2 + $0xa8] sm:$0xff] %vm281_vm1, %v270_v10 }
0x10f2   :  { %v2727_v11 = vpop.eup %2726 }
0x10f4   :  { %v2729_v15 = vpop.eup %2728 }
0x10f5   :  { %v2731_v22 = vpop.eup %2730 }
0x114b   :  { %v1299_v13 = vpop.permute.xlu1 %1298 }
0x114c   :  { %v1307_v14 = vmul.f32 %v2727_v11, %v1299_v13 }
0x114d   :  { %v1301_v18 = vpop.permute.xlu0 %1300 }
0x114e   :  { %v1308_v19 = vmul.f32 %v2729_v15, %v1301_v18  ;;  %1313 = vrot.lane.b32.xlu0 %v1307_v14, %s2778_s27 }
0x114f   :  { %v1303_v23 = vpop.permute.xlu1 %1302 }
0x1150   :  { %v1309_v26 = vmul.f32 %v2731_v22, %v1303_v23  ;;  %1315 = vrot.lane.b32.xlu1 %v1308_v19, %s2778_s27 }
0x1152   :  { %1317 = vrot.lane.b32.xlu0 %v1309_v26, %s2778_s27  ;;  %v1382_v26 = vld [vmem:[#allocation2 + $0x90] sm:$0xff] }
0x11c0   :  { %v1314_v27 = vpop.permute.xlu0 %1313 }
0x11c1   :  { %v1322_v3 = vadd.f32 %v1314_v27, %v1206_v53 }
0x11c2   :  { %v1316_v28 = vpop.permute.xlu1 %1315 }
0x11c3   :  { %2732 = vtanh.f32 %v1322_v3  ;;  %v1323_v29 = vadd.f32 %v1316_v28, %v1207_v54  ;;  %v1384_v3 = vld [vmem:[#allocation2 + $0xa0] sm:$0xff]  ;;  %v1383_v28 = vld [vmem:[#allocation2 + $0x98] sm:$0xff] }
0x11c4   :  { %v1318_v30 = vpop.permute.xlu0 %1317 }
0x11c5   :  { %2734 = vtanh.f32 %v1323_v29  ;;  %v1324_v33 = vadd.f32 %v1318_v30, %v1208_v56 }
0x11c7   :  { %2736 = vtanh.f32 %v1324_v33 }
0x11cd   :  { %v2733_v35 = vpop.eup %2732 }
0x11ce   :  { %v1328_v36 = vsub.f32 %v3081_v24, %v2733_v35 }
0x11cf   :  { %v2735_v37 = vpop.eup %2734 }
0x11d0   :  { %1334 = vrot.lane.b32.xlu1 %v1328_v36, %s2779_s28  ;;  %v1329_v38 = vsub.f32 %v3083_v25, %v2735_v37 }
0x11d1   :  { %v2737_v39 = vpop.eup %2736 }
0x11d2   :  { %1336 = vrot.lane.b32.xlu0 %v1329_v38, %s2779_s28  ;;  %v1330_v40 = vsub.f32 %v3085_v7, %v2737_v39 }
0x11d4   :  { %1338 = vrot.lane.b32.xlu1 %v1330_v40, %s2779_s28 }
0x1242   :  { %v1335_v43 = vpop.permute.xlu1 %1334 }
0x1243   :  { %v1343_v44 = vmul.f32 %v2727_v11, %v1335_v43 }
0x1244   :  { %v1337_v45 = vpop.permute.xlu0 %1336 }
0x1245   :  { %v1344_v48 = vmul.f32 %v2729_v15, %v1337_v45  ;;  %1349 = vrot.lane.b32.xlu0 %v1343_v44, %s2780_s7 }
0x1246   :  { %v1339_v50 = vpop.permute.xlu1 %1338 }
0x1247   :  { %v1345_v51 = vmul.f32 %v2731_v22, %v1339_v50  ;;  %1351 = vrot.lane.b32.xlu1 %v1344_v48, %s2780_s7 }
0x1249   :  { %1353 = vrot.lane.b32.xlu0 %v1345_v51, %s2780_s7 }
0x12b7   :  { %v1350_v52 = vpop.permute.xlu0 %1349 }
0x12b8   :  { %v3135_v54 = vadd.f32 %v2733_v35, %v1350_v52 }
0x12b9   :  { %v1352_v53 = vpop.permute.xlu1 %1351 }
0x12ba   :  { %v3137_v55 = vadd.f32 %v2735_v37, %v1352_v53 }
0x12bb   :  { %v1354_v56 = vpop.permute.xlu0 %1353 }
0x12bc   :  { %v3139_v57 = vadd.f32 %v2737_v39, %v1354_v56  ;;  %v1385_v60 = vpack.c.bf16 %v3137_v55, %v3135_v54 }
0x12be   :  { %1389 = vrot.lane.b32.xlu1 %v1385_v60, %s2778_s27  ;;  %v1386_v62 = vpack.c.bf16 %v3139_v57, %v3139_v57 }
0x12c0   :  { %1391 = vrot.lane.b32.xlu0 %v1386_v62, %s2778_s27 }
0x1330   :  { %v1390_v11 = vpop.permute.xlu1 %1389 }
0x1331   :  { %2517 = vmatprep.mubr.msk.bf16.mxu0 %vm335_vm2, %v1390_v11 }
0x1332   :  { %v1392_v13 = vpop.permute.xlu0 %1391 }
0x1333   :  { %2518 = vmatmul.mubr.msk.bf16.vlgmr.msra.gmra.mrb[24].mxu0 %vm335_vm2, %v1392_v13 }
0x1406   :  { %v2519_v14 = vpop.f32.mrb[24].mxu0 }
0x1407   :  { %v1433_v15 = vpop.f32.mrb[25].mxu0  ;;  %v1470_v12 = vadd.f32 %v2519_v14, %v2862_v21  ;;  %v1449_v30 = vadd.f32 %v2519_v14, %v1384_v3 }
0x1408   :  { %v1468_v18 = vadd.f32 %v1433_v15, %v2862_v21  ;;  %v2520_v19 = vpop.f32.mrb[26].mxu0  ;;  %v1447_v27 = vadd.f32 %v1433_v15, %v1382_v26 }
0x1409   :  { %v1436_v22 = vpop.f32.mrb[27].mxu0  ;;  %v2342_v36 = vmul.f32 -1.442695, %v1449_v30 }
0x140a   :  { %v1469_v23 = vadd.f32 %v1436_v22, %v2862_v21  ;;  %1474 = vrot.lane.b32.xlu1 %v1468_v18, %s2778_s27  ;;  %v1448_v29 = vadd.f32 %v1436_v22, %v1383_v28  ;;  %v2340_v33 = vmul.f32 -1.442695, %v1447_v27 }
0x140c   :  { %1476 = vrot.lane.b32.xlu0 %v1469_v23, %s2778_s27  ;;  %v2341_v35 = vmul.f32 -1.442695, %v1448_v29  ;;  %2738 = vpow2.f32 %v2340_v33 }
0x140e   :  { %1478 = vrot.lane.b32.xlu1 %v1470_v12, %s2778_s27  ;;  %2740 = vpow2.f32 %v2341_v35 }
0x140f   :  { %2742 = vpow2.f32 %v2342_v36 }
0x1416   :  { %v2739_v37 = vpop.eup %2738 }
0x1417   :  { %v1459_v39 = vadd.f32 1.0, %v2739_v37 }
0x1418   :  { %v2741_v38 = vpop.eup %2740 }
0x1419   :  { %v2743_v40 = vpop.eup %2742  ;;  %v1460_v41 = vadd.f32 1.0, %v2741_v38  ;;  %2744 = vrcp.f32 %v1459_v39 }
0x141a   :  { %v1461_v42 = vadd.f32 1.0, %v2743_v40 }
0x141b   :  { %2746 = vrcp.f32 %v1460_v41 }
0x141c   :  { %2748 = vrcp.f32 %v1461_v42 }
0x1423   :  { %v2745_v43 = vpop.eup %2744 }
0x1425   :  { %v2747_v48 = vpop.eup %2746 }
0x1426   :  { %v2749_v52 = vpop.eup %2748 }
0x147c   :  { %v1475_v44 = vpop.permute.xlu1 %1474 }
0x147d   :  { %v1483_v45 = vmul.f32 %v2745_v43, %v1475_v44  ;;  %v1558_v44 = vld [vmem:[#allocation2 + $0xa8] sm:$0xff] }
0x147e   :  { %v1477_v50 = vpop.permute.xlu0 %1476 }
0x147f   :  { %v1484_v51 = vmul.f32 %v2747_v48, %v1477_v50  ;;  %1489 = vrot.lane.b32.xlu0 %v1483_v45, %s2778_s27 }
0x1480   :  { %v1479_v53 = vpop.permute.xlu1 %1478 }
0x1481   :  { %v1485_v56 = vmul.f32 %v2749_v52, %v1479_v53  ;;  %1491 = vrot.lane.b32.xlu1 %v1484_v51, %s2778_s27  ;;  %v1560_v51 = vld [vmem:[#allocation2 + $0xb8] sm:$0xff] }
0x1483   :  { %1493 = vrot.lane.b32.xlu0 %v1485_v56, %s2778_s27 }
0x14f1   :  { %v1490_v60 = vpop.permute.xlu0 %1489 }
0x14f2   :  { %v1498_v62 = vadd.f32 %v1490_v60, %v1382_v26 }
0x14f3   :  { %v1492_v63 = vpop.permute.xlu1 %1491 }
0x14f4   :  { %2750 = vtanh.f32 %v1498_v62  ;;  %v1499_v0 = vadd.f32 %v1492_v63, %v1383_v28 }
0x14f5   :  { %v1494_v1 = vpop.permute.xlu0 %1493 }
0x14f6   :  { %2752 = vtanh.f32 %v1499_v0  ;;  %v1500_v5 = vadd.f32 %v1494_v1, %v1384_v3 }
0x14f8   :  { %2754 = vtanh.f32 %v1500_v5 }
0x14fe   :  { %v2751_v6 = vpop.eup %2750 }
0x14ff   :  { %v1504_v8 = vsub.f32 %v3135_v54, %v2751_v6 }
0x1500   :  { %v2753_v9 = vpop.eup %2752 }
0x1501   :  { %1510 = vrot.lane.b32.xlu1 %v1504_v8, %s2779_s28  ;;  %v1505_v10 = vsub.f32 %v3137_v55, %v2753_v9 }
0x1502   :  { %v2755_v11 = vpop.eup %2754 }
0x1503   :  { %1512 = vrot.lane.b32.xlu0 %v1505_v10, %s2779_s28  ;;  %v1506_v13 = vsub.f32 %v3139_v57, %v2755_v11 }
0x1505   :  { %1514 = vrot.lane.b32.xlu1 %v1506_v13, %s2779_s28 }
0x1573   :  { %v1511_v14 = vpop.permute.xlu1 %1510 }
0x1574   :  { %v1519_v15 = vmul.f32 %v2745_v43, %v1511_v14 }
0x1575   :  { %v1513_v18 = vpop.permute.xlu0 %1512 }
0x1576   :  { %v1520_v19 = vmul.f32 %v2747_v48, %v1513_v18  ;;  %1525 = vrot.lane.b32.xlu0 %v1519_v15, %s2780_s7  ;;  %v1559_v48 = vld [vmem:[#allocation2 + $0xb0] sm:$0xff] }
0x1577   :  { %v1515_v22 = vpop.permute.xlu1 %1514 }
0x1578   :  { %v1521_v23 = vmul.f32 %v2749_v52, %v1515_v22  ;;  %1527 = vrot.lane.b32.xlu1 %v1520_v19, %s2780_s7 }
0x157a   :  { %1529 = vrot.lane.b32.xlu0 %v1521_v23, %s2780_s7 }
0x15e8   :  { %v1526_v12 = vpop.permute.xlu0 %1525 }
0x15e9   :  { %v3175_v27 = vadd.f32 %v2751_v6, %v1526_v12 }
0x15ea   :  { %v1528_v26 = vpop.permute.xlu1 %1527 }
0x15eb   :  { %v3177_v3 = vadd.f32 %v2753_v9, %v1528_v26 }
0x15ec   :  { %v1530_v28 = vpop.permute.xlu0 %1529 }
0x15ed   :  { %v3179_v29 = vadd.f32 %v2755_v11, %v1530_v28  ;;  %v1561_v30 = vpack.c.bf16 %v3177_v3, %v3175_v27 }
0x15ef   :  { %v1562_v33 = vpack.c.bf16 %v3179_v29, %v3179_v29  ;;  %1565 = vrot.lane.b32.xlu1 %v1561_v30, %s2778_s27  ;;  %v314_v30 = vld [vmem:[%s3391_s1] sm:$0xff] }
0x15f1   :  { %1567 = vrot.lane.b32.xlu0 %v1562_v33, %s2778_s27  ;;  %v315_v33 = vld [vmem:[%s3391_s1 + $0x8] sm:$0xff] }
0x1661   :  { %v1566_v35 = vpop.permute.xlu1 %1565 }
0x1662   :  { %2525 = vmatprep.mubr.msk.bf16.mxu1 %vm335_vm2, %v1566_v35  ;;  %v2305_v35 = vadd.s32 4294967295, %v314_v30 }
0x1663   :  { %v1568_v36 = vpop.permute.xlu0 %1567 }
0x1664   :  { %2526 = vmatmul.mubr.msk.bf16.vlgmr.msra.gmra.mrb[24].mxu1 %vm335_vm2, %v1568_v36  ;;  %vm481_vm3 = vcmp.eq.s32.totalorder %v2305_v35, 0  ;;  %vm657_vm6 = vcmp.eq.s32.totalorder %v2305_v35, 1  ;;  %vm833_vm8 = vcmp.eq.s32.totalorder %v2305_v35, 2  ;;  %vm1009_vm10 = vcmp.eq.s32.totalorder %v2305_v35, 3 }
0x1665   :  { %vm1185_vm12 = vcmp.eq.s32.totalorder %v2305_v35, 4  ;;  %vm1361_vm14 = vcmp.eq.s32.totalorder %v2305_v35, 5  ;;  %vm1537_vm1 = vcmp.eq.s32.totalorder %v2305_v35, 6 }
0x1737   :  { %v2527_v37 = vpop.f32.mrb[24].mxu1 }
0x1738   :  { %v1609_v38 = vpop.f32.mrb[25].mxu1  ;;  %v1646_v43 = vadd.f32 %v2527_v37, %v2862_v21  ;;  %v1625_v52 = vadd.f32 %v2527_v37, %v1560_v51 }
0x1739   :  { %v1644_v39 = vadd.f32 %v1609_v38, %v2862_v21  ;;  %v2528_v40 = vpop.f32.mrb[26].mxu1  ;;  %v1623_v45 = vadd.f32 %v1609_v38, %v1558_v44  ;;  %v2306_v38 = vadd.s32 4294967295, %v315_v33 }
0x173a   :  { %v1612_v41 = vpop.f32.mrb[27].mxu1  ;;  %v2347_v60 = vmul.f32 -1.442695, %v1625_v52 }
0x173b   :  { %v1645_v42 = vadd.f32 %v1612_v41, %v2862_v21  ;;  %1650 = vrot.lane.b32.xlu1 %v1644_v39, %s2778_s27  ;;  %v1624_v50 = vadd.f32 %v1612_v41, %v1559_v48  ;;  %v2345_v53 = vmul.f32 -1.442695, %v1623_v45  ;;  %vm482_vm4 = vcmp.eq.s32.totalorder %v2306_v38, 0 }
0x173c   :  { %vm658_vm5 = vcmp.eq.s32.totalorder %v2306_v38, 1  ;;  %vm834_vm7 = vcmp.eq.s32.totalorder %v2306_v38, 2  ;;  %vm1010_vm9 = vcmp.eq.s32.totalorder %v2306_v38, 3  ;;  %vm1186_vm11 = vcmp.eq.s32.totalorder %v2306_v38, 4 }
0x173d   :  { %1652 = vrot.lane.b32.xlu0 %v1645_v42, %s2778_s27  ;;  %v2346_v56 = vmul.f32 -1.442695, %v1624_v50  ;;  %2756 = vpow2.f32 %v2345_v53  ;;  %v661_v45 = vsel %vm658_vm5, 1, %v2777_v2  ;;  %v837_v50 = vsel %vm834_vm7, 1, %v2777_v2 }
0x173e   :  { %v1013_v52 = vsel %vm1010_vm9, 1, %v2777_v2  ;;  %v1012_v53 = vsel %vm1009_vm10, 1, %v2777_v2  ;;  %vm1362_vm13 = vcmp.eq.s32.totalorder %v2306_v38, 5  ;;  %vm1538_vm15 = vcmp.eq.s32.totalorder %v2306_v38, 6 }
0x173f   :  { %1654 = vrot.lane.b32.xlu1 %v1646_v43, %s2778_s27  ;;  %2758 = vpow2.f32 %v2346_v56  ;;  %v484_v43 = vsel %vm481_vm3, 1, %v2777_v2  ;;  %v1189_v56 = vsel %vm1186_vm11, 1, %v2777_v2  ;;  %vm1714_vm3 = vcmp.eq.s32.totalorder %v2306_v38, 7 }
0x1740   :  { %2760 = vpow2.f32 %v2347_v60  ;;  %v1188_v60 = vsel %vm1185_vm12, 1, %v2777_v2  ;;  %v2781_v38 = vmov 0.0  }
0x1741   :  { %2537 = vmatprep.subr.bf16.mxu1 %v2781_v38  ;;  %2529 = vmatprep.subr.bf16.mxu0 %v2781_v38 }
0x1747   :  { %v2757_v62 = vpop.eup %2756 }
0x1748   :  { %v1635_v0 = vadd.f32 1.0, %v2757_v62  ;;  %v1365_v62 = vsel %vm1362_vm13, 1, %v2777_v2  ;;  %vm2782_vm13 = vmmov 0  }
0x1749   :  { %v2759_v63 = vpop.eup %2758  ;;  %2541 = vmatprep.mubr.msk.bf16.mxu1 %vm2782_vm13, %v2781_v38  ;;  %2533 = vmatprep.mubr.msk.bf16.mxu0 %vm2782_vm13, %v2781_v38 }
0x174a   :  { %v2761_v21 = vpop.eup %2760  ;;  %v1636_v1 = vadd.f32 1.0, %v2759_v63  ;;  %2762 = vrcp.f32 %v1635_v0  ;;  %v1364_v63 = vsel %vm1361_vm14, 1, %v2777_v2  ;;  %v316_v0 = vld [vmem:[%s3391_s1 + $0x10] sm:$0xff] }
0x174b   :  { %v1637_v5 = vadd.f32 1.0, %v2761_v21  ;;  %v1541_v21 = vsel %vm1538_vm15, 1, %v2777_v2 }
0x174c   :  { %2764 = vrcp.f32 %v1636_v1  ;;  %v2307_v1 = vadd.s32 4294967295, %v316_v0 }
0x174d   :  { %2766 = vrcp.f32 %v1637_v5  ;;  %v1540_v5 = vsel %vm1537_vm1, 1, %v2777_v2 }
0x174e   :  { %vm659_vm5 = vcmp.eq.s32.totalorder %v2307_v1, 1  ;;  %vm1011_vm7 = vcmp.eq.s32.totalorder %v2307_v1, 3  ;;  %vm1363_vm9 = vcmp.eq.s32.totalorder %v2307_v1, 5  ;;  %vm1187_vm10 = vcmp.eq.s32.totalorder %v2307_v1, 4 }
0x174f   :  { %vm1539_vm11 = vcmp.eq.s32.totalorder %v2307_v1, 6  ;;  %vm1715_vm12 = vcmp.eq.s32.totalorder %v2307_v1, 7 }
0x1750   :  { %v1542_v30 = vsel %vm1539_vm11, 1, %v2777_v2 }
0x1754   :  { %v3195_v6 = vpop.eup %2762 }
0x1756   :  { %v3198_v10 = vpop.eup %2764 }
0x1757   :  { %v3202_v14 = vpop.eup %2766 }
0x17ad   :  { %v1651_v8 = vpop.permute.xlu1 %1650 }
0x17ae   :  { %v1659_v9 = vmul.f32 %v3195_v6, %v1651_v8  ;;  %v1717_v8 = vsel %vm1714_vm3, 1, %v2777_v2 }
0x17af   :  { %v1653_v11 = vpop.permute.xlu0 %1652 }
0x17b0   :  { %v1660_v13 = vmul.f32 %v3198_v10, %v1653_v11  ;;  %1665 = vrot.lane.b32.xlu0 %v1659_v9, %s2778_s27  ;;  %v662_v11 = vsel %vm659_vm5, 1, %v2777_v2 }
0x17b1   :  { %v1655_v15 = vpop.permute.xlu1 %1654 }
0x17b2   :  { %v1661_v18 = vmul.f32 %v3202_v14, %v1655_v15  ;;  %1667 = vrot.lane.b32.xlu1 %v1660_v13, %s2778_s27  ;;  %v1014_v15 = vsel %vm1011_vm7, 1, %v2777_v2 }
0x17b4   :  { %1669 = vrot.lane.b32.xlu0 %v1661_v18, %s2778_s27 }
0x1822   :  { %v1666_v19 = vpop.permute.xlu0 %1665 }
0x1823   :  { %v1674_v22 = vadd.f32 %v1666_v19, %v1558_v44  ;;  %v485_v44 = vsel %vm482_vm4, 1, %v2777_v2  ;;  %vm1713_vm4 = vcmp.eq.s32.totalorder %v2305_v35, 7  ;;  %v1366_v19 = vsel %vm1363_vm9, 1, %v2777_v2 }
0x1824   :  { %v1668_v23 = vpop.permute.xlu1 %1667  ;;  %v1716_v9 = vsel %vm1713_vm4, 1, %v2777_v2  ;;  %v1718_v35 = vsel %vm1715_vm12, 1, %v2777_v2 }
0x1825   :  { %2768 = vtanh.f32 %v1674_v22  ;;  %v1675_v12 = vadd.f32 %v1668_v23, %v1559_v48  ;;  %v660_v48 = vsel %vm657_vm6, 1, %v2777_v2  ;;  %vm483_vm6 = vcmp.eq.s32.totalorder %v2307_v1, 0 }
0x1826   :  { %v1670_v26 = vpop.permute.xlu0 %1669  ;;  %v486_v13 = vsel %vm483_vm6, 1, %v2777_v2  ;;  %v1190_v22 = vsel %vm1187_vm10, 1, %v2777_v2 }
0x1827   :  { %2770 = vtanh.f32 %v1675_v12  ;;  %v1676_v28 = vadd.f32 %v1670_v26, %v1560_v51  ;;  %v836_v51 = vsel %vm833_vm8, 1, %v2777_v2  ;;  %vm835_vm8 = vcmp.eq.s32.totalorder %v2307_v1, 2 }
0x1828   :  { %v838_v18 = vsel %vm835_vm8, 1, %v2777_v2  ;;  %v2618_v2 = vld [vmem:[%s3388_s2 + $0x20] sm:$0xff]  }
0x1829   :  { %2772 = vtanh.f32 %v1676_v28 }
0x182f   :  { %v3213_v36 = vpop.eup %2768 }
0x1830   :  { %v1680_v37 = vsub.f32 %v3175_v27, %v3213_v36 }
0x1831   :  { %v3217_v39 = vpop.eup %2770 }
0x1832   :  { %1686 = vrot.lane.b32.xlu1 %v1680_v37, %s2779_s28  ;;  %v1681_v40 = vsub.f32 %v3177_v3, %v3217_v39 }
0x1833   :  { %v3222_v41 = vpop.eup %2772 }
0x1834   :  { %1688 = vrot.lane.b32.xlu0 %v1681_v40, %s2779_s28  ;;  %v1682_v42 = vsub.f32 %v3179_v29, %v3222_v41 }
0x1836   :  { %1690 = vrot.lane.b32.xlu1 %v1682_v42, %s2779_s28 }
0x1838   :  { %488 = vperm.xlu0 %2599, %v484_v43  }
0x183a   :  { %491 = vperm.xlu1 %2600, %v485_v44  }
0x183c   :  { %667 = vperm.xlu0 %2599, %v661_v45  }
0x183e   :  { %664 = vperm.xlu1 %2600, %v660_v48  }
0x1840   :  { %843 = vperm.xlu0 %2599, %v837_v50  }
0x1842   :  { %840 = vperm.xlu1 %2600, %v836_v51  }
0x1844   :  { %1019 = vperm.xlu0 %2599, %v1013_v52  }
0x1846   :  { %1016 = vperm.xlu1 %2600, %v1012_v53  }
0x1848   :  { %1195 = vperm.xlu0 %2599, %v1189_v56  }
0x184a   :  { %1192 = vperm.xlu1 %2600, %v1188_v60  }
0x184c   :  { %1371 = vperm.xlu0 %2599, %v1365_v62  }
0x184e   :  { %1368 = vperm.xlu1 %2600, %v1364_v63  }
0x1850   :  { %1547 = vperm.xlu0 %2599, %v1541_v21  }
0x1852   :  { %1544 = vperm.xlu1 %2600, %v1540_v5  }
0x1854   :  { %1723 = vperm.xlu0 %2599, %v1717_v8  }
0x1856   :  { %1720 = vperm.xlu1 %2600, %v1716_v9  }
0x1858   :  { %670 = vperm.xlu0 %2599, %v662_v11  }
0x185a   :  { %494 = vperm.xlu1 %2600, %v486_v13  }
0x185c   :  { %1022 = vperm.xlu0 %2599, %v1014_v15  }
0x185e   :  { %846 = vperm.xlu1 %2600, %v838_v18  }
0x1860   :  { %1374 = vperm.xlu0 %2599, %v1366_v19  }
0x1862   :  { %1198 = vperm.xlu1 %2600, %v1190_v22  }
0x18a4   :  { %v1687_v23 = vpop.permute.xlu1 %1686 }
0x18a5   :  { %v1695_v12 = vmul.f32 %v3195_v6, %v1687_v23  ;;  %v2616_v6 = vld [vmem:[%s3388_s2 + $0x18] sm:$0xff]  }
0x18a6   :  { %v1689_v26 = vpop.permute.xlu0 %1688  ;;  %2538 = vmatpush3.bf16.msra.mxu1 %v2616_v6 }
0x18a7   :  { %v1696_v28 = vmul.f32 %v3198_v10, %v1689_v26  ;;  %1701 = vrot.lane.b32.xlu1 %v1695_v12, %s2780_s7  ;;  %v2617_v10 = vld [vmem:[%s3388_s2 + $0x28] sm:$0xff]   ;;  %2539 = vmatprep.subr.bf16.mxu1 %v2781_v38 }
0x18a8   :  { %v1691_v33 = vpop.permute.xlu1 %1690  ;;  %2530 = vmatpush3.bf16.msra.mxu0 %v2617_v10 }
0x18a9   :  { %1703 = vrot.lane.b32.xlu0 %v1696_v28, %s2780_s7  ;;  %v1697_v37 = vmul.f32 %v3202_v14, %v1691_v33  ;;  %v2619_v14 = vld [vmem:[%s3388_s2 + $0x30] sm:$0xff]   ;;  %2531 = vmatprep.subr.bf16.mxu0 %v2781_v38 }
0x18aa   :  { %2540 = vmatpush3.bf16.msra.mxu1 %v2618_v2 }
0x18ab   :  { %1550 = vperm.xlu1 %2600, %v1542_v30   ;;  %2553 = vmatprep.subr.bf16.mxu1 %v2781_v38 }
0x18ac   :  { %2532 = vmatpush3.bf16.msra.mxu0 %v2619_v14 }
0x18ad   :  { %1726 = vperm.xlu0 %2599, %v1718_v35   ;;  %2545 = vmatprep.subr.bf16.mxu0 %v2781_v38 }
0x18af   :  { %1705 = vrot.lane.b32.xlu1 %v1697_v37, %s2780_s7 }
0x18b7   :  { %v489_v42 = vpop.permute.xlu0 %488 }
0x18b8   :  { %vm496_vm15 = vcmp.eq.s32.totalorder %v489_v42, 1  ;;  %v2623_v42 = vld [vmem:[%s3388_s2 + $0x50] sm:$0xff]  }
0x18b9   :  { %v492_v40 = vpop.permute.xlu1 %491  ;;  %v499_v15 = vsel %vm496_vm15, %v2889_v16, 0.0 }
0x18ba   :  { %vm497_vm14 = vcmp.eq.s32.totalorder %v492_v40, 1  ;;  %v2620_v40 = vld [vmem:[%s3388_s2 + $0x38] sm:$0xff]  }
0x18bb   :  { %v668_v44 = vpop.permute.xlu0 %667  ;;  %v500_v11 = vsel %vm497_vm14, %v2891_v17, 0.0 }
0x18bc   :  { %vm673_vm1 = vcmp.eq.s32.totalorder %v668_v44, 1  ;;  %v1929_v44 = vld [vmem:[%s3389_s0 + $0x64] sm:$0xf] }
0x18bd   :  { %v665_v43 = vpop.permute.xlu1 %664  ;;  %v676_v18 = vsel %vm673_vm1, %v2943_v32, %v500_v11 }
0x18be   :  { %vm672_vm3 = vcmp.eq.s32.totalorder %v665_v43, 1 }
0x18bf   :  { %v844_v48 = vpop.permute.xlu0 %843  ;;  %v675_v22 = vsel %vm672_vm3, %v2941_v31, %v499_v15 }
0x18c0   :  { %vm849_vm4 = vcmp.eq.s32.totalorder %v844_v48, 1  ;;  %v2625_v48 = vld [vmem:[%s3388_s2 + $0x58] sm:$0xff]  }
0x18c1   :  { %v841_v45 = vpop.permute.xlu1 %840  ;;  %v852_v23 = vsel %vm849_vm4, %v2987_v47, %v676_v18  ;;  %v2627_v18 = vld [vmem:[%s3388_s2 + $0x70] sm:$0xff]  }
0x18c2   :  { %vm848_vm5 = vcmp.eq.s32.totalorder %v841_v45, 1  ;;  %v2624_v45 = vld [vmem:[%s3388_s2 + $0x68] sm:$0xff]  }
0x18c3   :  { %v1020_v51 = vpop.permute.xlu0 %1019  ;;  %v851_v17 = vsel %vm848_vm5, %v2985_v46, %v675_v22 }
0x18c4   :  { %vm1025_vm6 = vcmp.eq.s32.totalorder %v1020_v51, 1 }
0x18c5   :  { %v1017_v50 = vpop.permute.xlu1 %1016  ;;  %v1028_v12 = vsel %vm1025_vm6, %v3031_v59, %v852_v23  ;;  %v1925_v23 = vsub.s32 2, %v2818_v4 }
0x18c6   :  { %vm1024_vm7 = vcmp.eq.s32.totalorder %v1017_v50, 1  ;;  %v2626_v50 = vld [vmem:[%s3388_s2 + $0x60] sm:$0xff]  }
0x18c7   :  { %v1196_v53 = vpop.permute.xlu0 %1195  ;;  %v1027_v28 = vsel %vm1024_vm7, %v3029_v58, %v851_v17 }
0x18c8   :  { %vm1201_vm8 = vcmp.eq.s32.totalorder %v1196_v53, 1  ;;  %v1934_v53 = vsub.s32 3, %v2818_v4 }
0x18c9   :  { %v1193_v52 = vpop.permute.xlu1 %1192  ;;  %v1204_v32 = vsel %vm1201_vm8, %v3083_v25, %v1028_v12 }
0x18ca   :  { %vm1200_vm9 = vcmp.eq.s32.totalorder %v1193_v52, 1 }
0x18cb   :  { %v1372_v60 = vpop.permute.xlu0 %1371  ;;  %v1203_v31 = vsel %vm1200_vm9, %v3081_v24, %v1027_v28 }
0x18cc   :  { %vm1377_vm10 = vcmp.eq.s32.totalorder %v1372_v60, 1 }
0x18cd   :  { %v1369_v56 = vpop.permute.xlu1 %1368  ;;  %v1380_v30 = vsel %vm1377_vm10, %v3137_v55, %v1204_v32 }
0x18ce   :  { %vm1376_vm11 = vcmp.eq.s32.totalorder %v1369_v56, 1 }
0x18cf   :  { %v1548_v63 = vpop.permute.xlu0 %1547  ;;  %v1379_v46 = vsel %vm1376_vm11, %v3135_v54, %v1203_v31 }
0x18d0   :  { %vm1553_vm12 = vcmp.eq.s32.totalorder %v1548_v63, 1 }
0x18d1   :  { %v1545_v62 = vpop.permute.xlu1 %1544  ;;  %v1556_v33 = vsel %vm1553_vm12, %v3177_v3, %v1380_v30 }
0x18d2   :  { %vm1552_vm14 = vcmp.eq.s32.totalorder %v1545_v62, 1 }
0x18d3   :  { %v1724_v21 = vpop.permute.xlu0 %1723  ;;  %v1555_v35 = vsel %vm1552_vm14, %v3175_v27, %v1379_v46 }
0x18d4   :  { %vm1729_vm1 = vcmp.eq.s32.totalorder %v1724_v21, 1 }
0x18d5   :  { %v1721_v0 = vpop.permute.xlu1 %1720 }
0x18d6   :  { %vm1728_vm15 = vcmp.eq.s32.totalorder %v1721_v0, 1 }
0x18d7   :  { %v671_v5 = vpop.permute.xlu0 %670 }
0x18d8   :  { %vm674_vm4 = vcmp.eq.s32.totalorder %v671_v5, 1  ;;  %v2776_v5 = vld [vmem:[%s3390_s3] sm:$0xff] }
0x18d9   :  { %v495_v1 = vpop.permute.xlu1 %494  ;;  %v1926_v17 = vrot.slane %v2776_v5, %v1925_v23 }
0x18da   :  { %vm498_vm3 = vcmp.eq.s32.totalorder %v495_v1, 1 }
0x18db   :  { %v1023_v9 = vpop.permute.xlu0 %1022  ;;  %v501_v25 = vsel %vm498_vm3, %v2895_v20, 0.0 }
0x18dc   :  { %v677_v54 = vsel %vm674_vm4, %v2945_v34, %v501_v25  ;;  %vm1026_vm6 = vcmp.eq.s32.totalorder %v1023_v9, 1  ;;  %v2629_v25 = vld [vmem:[%s3388_s2 + $0x80] sm:$0xff]  }
0x18dd   :  { %v847_v8 = vpop.permute.xlu1 %846 }
0x18de   :  { %vm850_vm5 = vcmp.eq.s32.totalorder %v847_v8, 1  ;;  %v1935_v8 = vrot.slane %v2776_v5, %v1934_v53 }
0x18df   :  { %v1375_v19 = vpop.permute.xlu0 %1374  ;;  %v853_v55 = vsel %vm850_vm5, %v2989_v49, %v677_v54 }
0x18e0   :  { %v1029_v3 = vsel %vm1026_vm6, %v3033_v61, %v853_v55  ;;  %vm1378_vm8 = vcmp.eq.s32.totalorder %v1375_v19, 1  ;;  %v2621_v61 = vld [vmem:[%s3388_s2 + $0x48] sm:$0xff]  }
0x18e1   :  { %v1199_v13 = vpop.permute.xlu1 %1198 }
0x18e2   :  { %vm1202_vm7 = vcmp.eq.s32.totalorder %v1199_v13, 1 }
0x1919   :  { %v1702_v26 = vpop.permute.xlu1 %1701 }
0x191a   :  { %v1710_v16 = vadd.f32 %v3213_v36, %v1702_v26 }
0x191b   :  { %v1704_v47 = vpop.permute.xlu0 %1703 }
0x191c   :  { %v1711_v59 = vadd.f32 %v3217_v39, %v1704_v47  ;;  %v1731_v58 = vsel %vm1728_vm15, %v1710_v16, %v1555_v35  ;;  %v1205_v39 = vsel %vm1202_vm7, %v3085_v7, %v1029_v3  ;;  %v1989_v16 = vsub.s32 4, %v2818_v4 }
0x191d   :  { %v1381_v2 = vsel %vm1378_vm8, %v3139_v57, %v1205_v39 }
0x191e   :  { %v1732_v37 = vsel %vm1729_vm1, %v1711_v59, %v1556_v33  ;;  %v1990_v46 = vrot.slane %v2776_v5, %v1989_v16 }
0x191f   :  { %v1734_v36 = vpack.c.bf16 %v1732_v37, %v1731_v58 }
0x1921   :  { %1803 = vrot.lane.b32.xlu1 %v1734_v36, %s2778_s27  ;;  %v1745_v24 = vrot.slane %v1734_v36, 4 }
0x1923   :  { %1746 = vrot.lane.b32.xlu0 %v1745_v24, %s2778_s27  ;;  %v2628_v24 = vld [vmem:[%s3388_s2 + $0x78] sm:$0xff]  }
0x192a   :  { %v1551_v27 = vpop.permute.xlu1 %1550 }
0x192b   :  { %vm1554_vm9 = vcmp.eq.s32.totalorder %v1551_v27, 1 }
0x192c   :  { %v1727_v6 = vpop.permute.xlu0 %1726  ;;  %v1557_v14 = vsel %vm1554_vm9, %v3179_v29, %v1381_v2  ;;  %v2622_v29 = vld [vmem:[%s3388_s2 + $0x40] sm:$0xff]   ;;  %v2207_v2 = vsub.s32 5, %v2818_v4 }
0x192d   :  { %vm1730_vm10 = vcmp.eq.s32.totalorder %v1727_v6, 1 }
0x192e   :  { %v1706_v10 = vpop.permute.xlu1 %1705 }
0x192f   :  { %v1712_v20 = vadd.f32 %v3222_v41, %v1706_v10  ;;  %v1928_v41 = vld [vmem:[%s3389_s0 + $0x60] sm:$0xf] }
0x1931   :  { %v1733_v34 = vsel %vm1730_vm10, %v1712_v20, %v1557_v14 }
0x1932   :  { %v1735_v49 = vpack.c.bf16 %v1733_v34, %v1733_v34  ;;  %v2208_v34 = vrot.slane %v2776_v5, %v2207_v2 }
0x1934   :  { %1865 = vrot.lane.b32.xlu0 %v1735_v49, %s2778_s27 }
0x1993   :  { %v1804_v7 = vpop.permute.xlu1 %1803 }
0x1994   :  { %2542 = vmatmul.mubr.msk.bf16.vlgmr.msra.gmra.mrb[28].mxu1 %vm335_vm2, %v1804_v7 }
0x1995   :  { %v1747_v57 = vpop.permute.xlu0 %1746  ;;  %2554 = vmatpush3.bf16.msra.mxu1 %v2621_v61  ;;  %2555 = vmatprep.mubr.msk.bf16.mxu1 %vm2782_vm13, %v2781_v38 }
0x1996   :  { %2534 = vmatmul.mubr.msk.bf16.vlgmr.msra.gmra.mrb[28].mxu0 %vm335_vm2, %v1747_v57  ;;  %2565 = vmatprep.subr.bf16.mxu1 %v2781_v38 }
0x1997   :  { %2546 = vmatpush3.bf16.msra.mxu0 %v2620_v40  ;;  %2549 = vmatprep.mubr.msk.bf16.mxu0 %vm2782_vm13, %v2781_v38 }
0x1998   :  { %2547 = vmatprep.subr.bf16.mxu0 %v2781_v38 }
0x199b   :  { %2548 = vmatpush3.bf16.msra.mxu0 %v2622_v29 }
0x199c   :  { %2556 = vmatmul.mubr.msk.bf16.vlgmr.msra.gmra.mrb[32].mxu1 %vm115_vm0, %v1928_v41  ;;  %2559 = vmatprep.subr.bf16.mxu0 %v2781_v38 }
0x199d   :  { %2567 = vmatprep.mubr.msk.bf16.mxu1 %vm2782_vm13, %v2781_v38  ;;  %2566 = vmatpush3.bf16.msra.mxu1 %v2624_v45 }
0x199e   :  { %2579 = vmatprep.subr.bf16.mxu1 %v2781_v38 }
0x19a6   :  { %v1866_v43 = vpop.permute.xlu0 %1865 }
0x19a7   :  { %2550 = vmatmul.mubr.msk.bf16.vlgmr.msra.gmra.mrb[32].mxu0 %vm335_vm2, %v1866_v43 }
0x19a8   :  { %2560 = vmatpush3.bf16.msra.mxu0 %v2623_v42  ;;  %2561 = vmatprep.mubr.msk.bf16.mxu0 %vm2782_vm13, %v2781_v38  ;;  %v2218_v42 = vsub.s32 6, %v2818_v4 }
0x19a9   :  { %2571 = vmatprep.subr.bf16.mxu0 %v2781_v38 }
0x19aa   :  { %v2219_v43 = vrot.slane %v2776_v5, %v2218_v42 }
0x19af   :  { %2562 = vmatmul.mubr.msk.bf16.vlgmr.msra.gmra.mrb[36].mxu0 %vm115_vm0, %v1929_v44 }
0x19b0   :  { %2575 = vmatprep.mubr.msk.bf16.mxu0 %vm2782_vm13, %v2781_v38  ;;  %2572 = vmatpush3.bf16.msra.mxu0 %v2625_v48 }
0x19b1   :  { %2573 = vmatprep.subr.bf16.mxu0 %v2781_v38 }
0x19b4   :  { %2574 = vmatpush3.bf16.msra.mxu0 %v2626_v50 }
0x19b5   :  { %2585 = vmatprep.subr.bf16.mxu0 %v2781_v38 }
0x1a67   :  { %v1854_v51 = vpop.f32.mrb[28].mxu1 }
0x1a68   :  { %v2543_v52 = vpop.f32.mrb[29].mxu1 }
0x1a69   :  { %v1797_v56 = vpop.f32.mrb[28].mxu0  ;;  %v1857_v60 = vpop.f32.mrb[30].mxu1 }
0x1a6a   :  { %v1855_v62 = vadd.f32 %v1854_v51, %v1797_v56  ;;  %v2535_v63 = vpop.f32.mrb[29].mxu0  ;;  %v2544_v0 = vpop.f32.mrb[31].mxu1 }
0x1a6b   :  { %v1800_v21 = vpop.f32.mrb[30].mxu0 }
0x1a6c   :  { %v2536_v1 = vpop.f32.mrb[31].mxu0 }
0x1a6f   :  { %v1979_v9 = vpop.f32.mrb[32].mxu1 }
0x1a70   :  { %v1980_v11 = vadd.f32 %v1979_v9, %v1935_v8  ;;  %v2557_v13 = vpop.f32.mrb[33].mxu1 }
0x1a71   :  { %v1982_v15 = vpop.f32.mrb[34].mxu1 }
0x1a72   :  { %v2045_v19 = vpack.c.bf16 %v1980_v11, %v1980_v11  ;;  %v2558_v22 = vpop.f32.mrb[35].mxu1 }
0x1a74   :  { %2568 = vmatmul.mubr.msk.bf16.vlgmr.msra.gmra.mrb[36].mxu1 %vm115_vm0, %v2045_v19 }
0x1a75   :  { %2580 = vmatpush3.bf16.msra.mxu1 %v2627_v18  ;;  %2581 = vmatprep.mubr.msk.bf16.mxu1 %vm2782_vm13, %v2781_v38 }
0x1a7a   :  { %v1916_v12 = vpop.f32.mrb[32].mxu0 }
0x1a7b   :  { %v1922_v26 = vadd.f32 %v1916_v12, %v1855_v62  ;;  %v2551_v28 = vpop.f32.mrb[33].mxu0 }
0x1a7c   :  { %v1919_v32 = vpop.f32.mrb[34].mxu0 }
0x1a7d   :  { %v1927_v31 = vadd.f32 %v1926_v17, %v1922_v26  ;;  %v2552_v47 = vpop.f32.mrb[35].mxu0 }
0x1a7f   :  { %v2040_v30 = vpack.c.bf16 %v1927_v31, %v1927_v31 }
0x1a81   :  { %2576 = vmatmul.mubr.msk.bf16.vlgmr.msra.gmra.mrb[40].mxu0 %vm335_vm2, %v2040_v30 }
0x1a82   :  { %v2034_v59 = vpop.f32.mrb[36].mxu0  ;;  %2589 = vmatprep.mubr.msk.bf16.mxu0 %vm2782_vm13, %v2781_v38  ;;  %2586 = vmatpush3.bf16.msra.mxu0 %v2628_v24 }
0x1a83   :  { %v2035_v33 = vadd.f32 %v2034_v59, %v1990_v46  ;;  %v2563_v35 = vpop.f32.mrb[37].mxu0  ;;  %2587 = vmatprep.subr.bf16.mxu0 %v2781_v38 }
0x1a84   :  { %v2037_v58 = vpop.f32.mrb[38].mxu0 }
0x1a85   :  { %v2152_v37 = vpack.c.bf16 %v2035_v33, %v2035_v33  ;;  %v2564_v36 = vpop.f32.mrb[39].mxu0 }
0x1a86   :  { %2588 = vmatpush3.bf16.msra.mxu0 %v2629_v25 }
0x1a87   :  { %2582 = vmatmul.mubr.msk.bf16.vlgmr.msra.gmra.mrb[40].mxu1 %vm115_vm0, %v2152_v37 }
0x1b47   :  { %v2091_v54 = vpop.f32.mrb[36].mxu1 }
0x1b48   :  { %v2569_v55 = vpop.f32.mrb[37].mxu1 }
0x1b49   :  { %v2094_v27 = vpop.f32.mrb[38].mxu1 }
0x1b4a   :  { %v2570_v3 = vpop.f32.mrb[39].mxu1 }
0x1b54   :  { %v2146_v39 = vpop.f32.mrb[40].mxu0 }
0x1b55   :  { %v2147_v6 = vadd.f32 %v2146_v39, %v2091_v54  ;;  %v2577_v10 = vpop.f32.mrb[41].mxu0 }
0x1b56   :  { %v2149_v20 = vpop.f32.mrb[42].mxu0 }
0x1b57   :  { %v2578_v14 = vpop.f32.mrb[43].mxu0 }
0x1b5a   :  { %v2198_v49 = vpop.f32.mrb[40].mxu1 }
0x1b5b   :  { %v2204_v61 = vadd.f32 %v2198_v49, %v2147_v6  ;;  %v2583_v38 = vpop.f32.mrb[41].mxu1 }
0x1b5c   :  { %v2201_v7 = vpop.f32.mrb[42].mxu1 }
0x1b5d   :  { %v2209_v40 = vadd.f32 %v2208_v34, %v2204_v61  ;;  %v2584_v57 = vpop.f32.mrb[43].mxu1 }
0x1b5f   :  { %v2210_v29 = vmax.f32 %v2209_v40, 0.0 }
0x1b61   :  { %v2211_v41 = vpack.c.bf16 %v2210_v29, %v2210_v29 }
0x1b63   :  { %2590 = vmatmul.mubr.msk.bf16.vlgmr.msra.gmra.mrb[44].mxu0 %vm335_vm2, %v2211_v41 }
0x1c36   :  { %v2269_v44 = vpop.f32.mrb[44].mxu0 }
0x1c37   :  { %v2270_v45 = vadd.f32 %v2269_v44, %v2219_v43  ;;  %v2591_v48 = vpop.f32.mrb[45].mxu0 }
0x1c38   :  { %v2272_v50 = vpop.f32.mrb[46].mxu0 }
0x1c39   :  { %2275 = vst [vmem:[%s3392_s4] sm:$0xff] %v2270_v45  ;;  %v2592_v51 = vpop.f32.mrb[47].mxu0 }

</bundles_post_ra>
